<compile_context>
chip_gen: v7x
topology: tpu7x:2x2x1
jax: 0.10.0
libtpu: 0.0.40
codegen_flags: <defaults>
</compile_context>

<pallas_src>
import jax
import jax.numpy as jnp
from jax import lax
from jax.experimental import pallas as pl
from jax.experimental.pallas import tpu as pltpu


# ---------------------------------------------------------------------------
# Encoder kernel: single-layer GRU over time-major src, zero initial hidden.
# Separate pallas_call so src never occupies VMEM during the decode loop.
# ---------------------------------------------------------------------------
def encoder_kernel(src_ref,      # [T_src, Bb, D] f32
                   wih_ref,      # [D, 3H]  bf16
                   whh_ref,      # [H, 3H]  bf16
                   brz_ref,      # [1, 2H]  f32  (e_bih[:2H] + e_bhh[:2H])
                   bin_ref,      # [1, H]   f32  (e_bih[2H:])
                   bhn_ref,      # [1, H]   f32  (e_bhh[2H:])
                   h_ref):       # out [Bb, H] f32: final hidden
    t_src, bb, _ = src_ref.shape
    h_dim = h_ref.shape[1]
    wih = wih_ref[...]
    whh = whh_ref[...]
    # biases broadcast once, outside the recurrent loop
    b_rz = jnp.broadcast_to(brz_ref[...], (bb, 2 * h_dim))
    b_in = jnp.broadcast_to(bin_ref[...], (bb, h_dim))
    b_hn = jnp.broadcast_to(bhn_ref[...], (bb, h_dim))

    def step(s, h):
        gi = jnp.dot(src_ref[s].astype(wih.dtype), wih,
                     preferred_element_type=jnp.float32)
        gh = jnp.dot(h.astype(whh.dtype), whh,
                     preferred_element_type=jnp.float32)
        rz = jax.nn.sigmoid(gi[:, :2 * h_dim] + gh[:, :2 * h_dim] + b_rz)
        r, z = rz[:, :h_dim], rz[:, h_dim:]
        n = jnp.tanh(gi[:, 2 * h_dim:] + b_in + r * (gh[:, 2 * h_dim:] + b_hn))
        return (1.0 - z) * n + z * h

    h_ref[...] = lax.fori_loop(0, t_src, step,
                               jnp.zeros((bb, h_dim), jnp.float32),
                               unroll=True)


# ---------------------------------------------------------------------------
# Decoder kernel: grid (batch blocks, time chunks).  Hidden state h, the
# pre-computed recurrent gates gh = h @ d_whh, and the previous argmax token
# are carried in VMEM scratch across time chunks ("arbitrary" axis).
# ---------------------------------------------------------------------------
def decoder_kernel(tf_ref,       # SMEM [T_pad] int32 teacher-force flags (scalar prefetch)
                   h0_ref,       # [Bb, H] f32 encoder final hidden (this batch block)
                   tok_ref,      # [T_chunk, Bb, 1] int32 target tokens for this chunk
                   wgi_ref,      # [V, 3H]      bf16: emb @ d_wih + d_bih (one-hot exact)
                   who_ref,      # [H, 3H + V]  bf16: [d_whh | o_w] shared-LHS fusion
                   brz_ref,      # [1, 2H] f32: d_bhh[:2H]
                   bhn_ref,      # [1, H]  f32: d_bhh[2H:]
                   ob_ref,       # [1, V]  f32: output bias
                   out_ref,      # [T_chunk, Bb, V] f32 logits (torch outputs[t+1])
                   h_sc,         # scratch VMEM [Bb, H]  f32
                   gh_sc,        # scratch VMEM [Bb, 3H] f32
                   tok_sc):      # scratch VMEM [Bb, 1]  int32 (prev argmax token)
    c = pl.program_id(1)
    t_chunk = out_ref.shape[0]
    bb, h_dim = h_sc.shape
    v_dim = out_ref.shape[-1]

    w_gi = wgi_ref[...]
    w_ho = who_ref[...]
    lane_iota = lax.broadcasted_iota(jnp.int32, (bb, v_dim), 1)
    b_rz = jnp.broadcast_to(brz_ref[...], (bb, 2 * h_dim))
    b_hn = jnp.broadcast_to(bhn_ref[...], (bb, h_dim))
    o_b = jnp.broadcast_to(ob_ref[...], (bb, v_dim))

    # First chunk of each batch block: seed the recurrence from the encoder.
    @pl.when(c == 0)
    def _():
        h0 = h0_ref[...]
        h_sc[...] = h0
        gh_sc[...] = jnp.dot(h0.astype(w_ho.dtype), w_ho[:, :3 * h_dim],
                             preferred_element_type=jnp.float32)
        tok_sc[...] = jnp.zeros((bb, 1), jnp.int32)

    def step(s, carry):
        h, gh, prev_tok = carry
        t = c * t_chunk + s                                   # global decode step
        # input token: target[t] if (t == 0 or teacher-forced) else prev argmax
        use_tgt = jnp.logical_or(t == 0, tf_ref[t] == 1)
        inp_tok = jnp.where(use_tgt, tok_ref[s], prev_tok)    # [Bb, 1] int32
        onehot = (lane_iota == inp_tok).astype(w_gi.dtype)    # exact one-hot (bf16)

        # input gates: embedding + W_ih + b_ih all folded into one matmul
        gi = jnp.dot(onehot, w_gi, preferred_element_type=jnp.float32)      # [Bb,3H]
        rz = jax.nn.sigmoid(gi[:, :2 * h_dim] + gh[:, :2 * h_dim] + b_rz)
        r, z = rz[:, :h_dim], rz[:, h_dim:]
        n = jnp.tanh(gi[:, 2 * h_dim:] + r * (gh[:, 2 * h_dim:] + b_hn))
        h_new = (1.0 - z) * n + z * h

        # shared-LHS fusion: gh for the NEXT step and this step's logits in one dot
        fused = jnp.dot(h_new.astype(w_ho.dtype), w_ho,
                        preferred_element_type=jnp.float32)                 # [Bb,3H+V]
        gh_new = fused[:, :3 * h_dim]
        logits = fused[:, 3 * h_dim:] + o_b
        out_ref[s] = logits.astype(out_ref.dtype)

        # greedy token (first maximal index, matches torch argmax tie-break);
        # cheap XLU reduction, kept unconditional to keep the carry branch-free.
        maxv = jnp.max(logits, axis=1, keepdims=True)
        amax = jnp.min(jnp.where(logits == maxv, lane_iota, v_dim),
                       axis=1, keepdims=True)                               # [Bb,1]
        return h_new, gh_new, amax

    h, gh, ptok = lax.fori_loop(0, t_chunk, step,
                                (h_sc[...], gh_sc[...], tok_sc[...]),
                                unroll=True)
    # carry state across time chunks
    h_sc[...] = h
    gh_sc[...] = gh
    tok_sc[...] = ptok


# ---------------------------------------------------------------------------
# Wrapper
# ---------------------------------------------------------------------------
def seq2seq_forward(src_frames, target, tf_flags, params, *,
                    block_b=None, t_chunk=8, compute_dtype=jnp.bfloat16):
    """src_frames: [B, T_src, D_in] f32; target: [B, T_tgt] int tokens.

    Returns [T_tgt - 1, B, V] f32 logits (== torch outputs[1:], time-major)."""
    src_frames = src_frames.astype(jnp.float32)
    target = target.astype(jnp.int32)
    tf_flags = tf_flags.astype(jnp.int32)

    B, T_src, D_in = src_frames.shape
    T_tgt = target.shape[1]
    H = params["d_whh"].shape[0]
    V = params["emb"].shape[0]
    T_out = T_tgt - 1

    # Batch block: fill the MXU M dimension. (On v7x, choose B so that
    # B // block_b >= 2 to feed both TensorCores.)
    if block_b is None:
        block_b = min(B, 128)
    assert B % block_b == 0 and (block_b % 8 == 0 or block_b == B), \
        "block_b must divide B and be a multiple of 8"
    nb = B // block_b

    # Time chunking: T_chunk decode steps per grid iteration.
    t_chunk = max(1, min(t_chunk, T_out))
    nc = pl.cdiv(T_out, t_chunk)
    T_pad = nc * t_chunk

    vmem = pl.BlockSpec(memory_space=pltpu.MemorySpace.VMEM)

    # ---------------- encoder ----------------
    src_tm = jnp.transpose(src_frames, (1, 0, 2))                     # [T_src, B, D]
    e_wih = params["e_wih"].astype(compute_dtype)                     # [D, 3H]
    e_whh = params["e_whh"].astype(compute_dtype)                     # [H, 3H]
    enc_brz = (params["e_bih"][:, :2 * H] + params["e_bhh"][:, :2 * H]).astype(jnp.float32)
    enc_bin = params["e_bih"][:, 2 * H:].astype(jnp.float32)
    enc_bhn = params["e_bhh"][:, 2 * H:].astype(jnp.float32)

    h0 = pl.pallas_call(
        encoder_kernel,
        out_shape=jax.ShapeDtypeStruct((B, H), jnp.float32),
        grid_spec=pltpu.PrefetchScalarGridSpec(
            num_scalar_prefetch=0,
            grid=(nb,),
            in_specs=[pl.BlockSpec((T_src, block_b, D_in), lambda b: (0, b, 0)),
                      vmem, vmem, vmem, vmem, vmem],
            out_specs=pl.BlockSpec((block_b, H), lambda b: (b, 0)),
            scratch_shapes=[]),
        compiler_params=pltpu.CompilerParams(dimension_semantics=("parallel",)),
    )(src_tm, e_wih, e_whh, enc_brz, enc_bin, enc_bhn)

    # ---------------- decoder ----------------
    # TODO(synk): torch draws random.random() per step; replaced here by the
    # precomputed deterministic mask tf_flags (convention documented above).
    tf_pad = jnp.pad(tf_flags[:T_out], (0, T_pad - T_out), constant_values=1)

    # decoder-input tokens (target[t] is step t's teacher input), tiny int stream
    tok = jnp.transpose(target[:, :T_out], (1, 0))[:, :, None]        # [T_out, B, 1]
    tok = jnp.pad(tok, ((0, T_pad - T_out), (0, 0), (0, 0)))

    # W_gi: embedding + input gates + d_bih folded (valid: input is exact one-hot)
    w_gi = (jnp.dot(params["emb"], params["d_wih"])
            + params["d_bih"]).astype(compute_dtype)                  # [V, 3H]
    # W_ho: [d_whh | o_w] — gh_{t+1} and logits_t share h_{t+1} as LHS
    w_ho = jnp.concatenate([params["d_whh"], params["o_w"]],
                           axis=1).astype(compute_dtype)              # [H, 3H + V]
    d_brz = params["d_bhh"][:, :2 * H].astype(jnp.float32)
    d_bhn = params["d_bhh"][:, 2 * H:].astype(jnp.float32)
    o_b = params["o_b"].astype(jnp.float32)                           # [1, V]

    out = pl.pallas_call(
        decoder_kernel,
        out_shape=jax.ShapeDtypeStruct((T_pad, B, V), jnp.float32),
        grid_spec=pltpu.PrefetchScalarGridSpec(
            num_scalar_prefetch=1,                                    # tf flags -> SMEM
            grid=(nb, nc),
            in_specs=[
                pl.BlockSpec((block_b, H), lambda b, c, tf: (b, 0)),
                pl.BlockSpec((t_chunk, block_b, 1), lambda b, c, tf: (c, b, 0)),
                vmem, vmem, vmem, vmem, vmem,                         # w_gi, w_ho, biases
            ],
            out_specs=pl.BlockSpec((t_chunk, block_b, V), lambda b, c, tf: (c, b, 0)),
            scratch_shapes=[
                pltpu.VMEM((block_b, H), jnp.float32),                # h
                pltpu.VMEM((block_b, 3 * H), jnp.float32),            # gh = h @ d_whh
                pltpu.VMEM((block_b, 1), jnp.int32),                  # prev argmax token
            ]),
        compiler_params=pltpu.CompilerParams(
            dimension_semantics=("parallel", "arbitrary")),
    )(tf_pad, h0, tok, w_gi, w_ho, d_brz, d_bhn, o_b)

    return out[:T_out]


def init_params(key, d_in, e_dim, h_dim, v_dim):
    keys = jax.random.split(key, 11)
    s = 0.1
    p = {}
    p["e_wih"] = jax.random.normal(keys[0], (d_in, 3 * h_dim), jnp.float32) * s
    p["e_whh"] = jax.random.normal(keys[1], (h_dim, 3 * h_dim), jnp.float32) * s
    p["e_bih"] = jax.random.normal(keys[2], (1, 3 * h_dim), jnp.float32) * s
    p["e_bhh"] = jax.random.normal(keys[3], (1, 3 * h_dim), jnp.float32) * s
    p["emb"]   = jax.random.normal(keys[4], (v_dim, e_dim), jnp.float32) * s
    p["d_wih"] = jax.random.normal(keys[5], (e_dim, 3 * h_dim), jnp.float32) * s
    p["d_whh"] = jax.random.normal(keys[6], (h_dim, 3 * h_dim), jnp.float32) * s
    p["d_bih"] = jax.random.normal(keys[7], (1, 3 * h_dim), jnp.float32) * s
    p["d_bhh"] = jax.random.normal(keys[8], (1, 3 * h_dim), jnp.float32) * s
    p["o_w"]   = jax.random.normal(keys[9], (h_dim, v_dim), jnp.float32) * s
    p["o_b"]   = jax.random.normal(keys[10], (1, v_dim), jnp.float32) * s
    return p


if __name__ == "__main__":
    B, T_src, T_tgt = 16, 6, 8
    D_in, E, H, V = 16, 32, 128, 128            # H/V lane-aligned (128)
    teacher_forcing_ratio = 0.5

    key = jax.random.PRNGKey(0)
    k_src, k_tgt, k_tf, k_p = jax.random.split(key, 4)

    src_frames = jax.random.normal(k_src, (B, T_src, D_in), jnp.float32)
    target = jax.random.randint(k_tgt, (B, T_tgt), 0, V, dtype=jnp.int32)
    # TODO(synk): deterministic stand-in for torch's per-step random.random()
    tf_flags = (jax.random.uniform(k_tf, (T_tgt,)) < teacher_forcing_ratio).astype(jnp.int32)

    params = init_params(k_p, D_in, E, H, V)

    out = seq2seq_forward(src_frames, target, tf_flags, params)
    out = jax.block_until_ready(out)

    assert out.shape == (T_tgt - 1, B, V), out.shape
    assert bool(jnp.all(jnp.isfinite(out)))
    print("KERNEL_OK")
</pallas_src>

<mosaic_0001>
module attributes {stable_mosaic.version = 11 : i64} {
  func.func @encoder_kernel(%arg0: i32, %arg1: memref<6x16x16xf32, #tpu.memory_space<vmem>>, %arg2: memref<16x384xbf16, #tpu.memory_space<vmem>>, %arg3: memref<128x384xbf16, #tpu.memory_space<vmem>>, %arg4: memref<1x256xf32, #tpu.memory_space<vmem>>, %arg5: memref<1x128xf32, #tpu.memory_space<vmem>>, %arg6: memref<1x128xf32, #tpu.memory_space<vmem>>, %arg7: memref<16x128xf32, #tpu.memory_space<vmem>>) attributes {dimension_semantics = [#tpu.dimension_semantics<parallel>], iteration_bounds = array<i64: 1>, scalar_prefetch = 0 : i64, scratch_operands = 0 : i64, tpu.core_type = #tpu.core_type<tc>, window_params = [{transform_indices = @transform_0, window_bounds = array<i64: 6, 16, 16>}, {pipeline_mode = #tpu.pipeline_mode<synchronous>, transform_indices = @transform_1, window_bounds = array<i64: 16, 384>}, {pipeline_mode = #tpu.pipeline_mode<synchronous>, transform_indices = @transform_2, window_bounds = array<i64: 128, 384>}, {pipeline_mode = #tpu.pipeline_mode<synchronous>, transform_indices = @transform_3, window_bounds = array<i64: 1, 256>}, {pipeline_mode = #tpu.pipeline_mode<synchronous>, transform_indices = @transform_4, window_bounds = array<i64: 1, 128>}, {pipeline_mode = #tpu.pipeline_mode<synchronous>, transform_indices = @transform_5, window_bounds = array<i64: 1, 128>}, {transform_indices = @transform_6, window_bounds = array<i64: 16, 128>}]} {
    %c0 = arith.constant 0 : index
    %c0_0 = arith.constant 0 : index
    %0 = vector.load %arg2[%c0, %c0_0] : memref<16x384xbf16, #tpu.memory_space<vmem>>, vector<16x384xbf16>
    %c0_1 = arith.constant 0 : index
    %c0_2 = arith.constant 0 : index
    %1 = vector.load %arg3[%c0_1, %c0_2] : memref<128x384xbf16, #tpu.memory_space<vmem>>, vector<128x384xbf16>
    %c0_3 = arith.constant 0 : index
    %c0_4 = arith.constant 0 : index
    %2 = vector.load %arg4[%c0_3, %c0_4] : memref<1x256xf32, #tpu.memory_space<vmem>>, vector<1x256xf32>
    %3 = vector.shape_cast %2 : vector<1x256xf32> to vector<1x256xf32>
    %4 = vector.broadcast %3 : vector<1x256xf32> to vector<16x256xf32>
    %c0_5 = arith.constant 0 : index
    %c0_6 = arith.constant 0 : index
    %5 = vector.load %arg5[%c0_5, %c0_6] : memref<1x128xf32, #tpu.memory_space<vmem>>, vector<1x128xf32>
    %6 = vector.shape_cast %5 : vector<1x128xf32> to vector<1x128xf32>
    %7 = vector.broadcast %6 : vector<1x128xf32> to vector<16x128xf32>
    %c0_7 = arith.constant 0 : index
    %c0_8 = arith.constant 0 : index
    %8 = vector.load %arg6[%c0_7, %c0_8] : memref<1x128xf32, #tpu.memory_space<vmem>>, vector<1x128xf32>
    %9 = vector.shape_cast %8 : vector<1x128xf32> to vector<1x128xf32>
    %10 = vector.broadcast %9 : vector<1x128xf32> to vector<16x128xf32>
    %cst = arith.constant 0.000000e+00 : f32
    %11 = vector.broadcast %cst : f32 to vector<16x128xf32>
    %c0_i32 = arith.constant 0 : i32
    %12 = arith.index_cast %c0_i32 : i32 to index
    %c0_9 = arith.constant 0 : index
    %c0_10 = arith.constant 0 : index
    %13 = vector.load %arg1[%12, %c0_9, %c0_10] : memref<6x16x16xf32, #tpu.memory_space<vmem>>, vector<1x16x16xf32>
    %14 = vector.shape_cast %13 : vector<1x16x16xf32> to vector<16x16xf32>
    %15 = arith.truncf %14 : vector<16x16xf32> to vector<16x16xbf16>
    %cst_11 = arith.constant dense<0.000000e+00> : vector<16x384xf32>
    %16 = tpu.matmul %15, %0, %cst_11 {dimension_numbers = #tpu.dot_dimension_numbers<[1], [0], [0], [1], [0, 0, 1, 1], [], []>} : vector<16x16xbf16>, vector<16x384xbf16>, vector<16x384xf32> -> vector<16x384xf32>
    %17 = arith.truncf %11 : vector<16x128xf32> to vector<16x128xbf16>
    %cst_12 = arith.constant dense<0.000000e+00> : vector<16x384xf32>
    %18 = tpu.matmul %17, %1, %cst_12 {dimension_numbers = #tpu.dot_dimension_numbers<[1], [0], [0], [1], [0, 0, 1, 1], [], []>} : vector<16x128xbf16>, vector<128x384xbf16>, vector<16x384xf32> -> vector<16x384xf32>
    %19 = vector.extract_strided_slice %16 {offsets = [0, 0], sizes = [16, 256], strides = [1, 1]} : vector<16x384xf32> to vector<16x256xf32>
    %20 = vector.extract_strided_slice %18 {offsets = [0, 0], sizes = [16, 256], strides = [1, 1]} : vector<16x384xf32> to vector<16x256xf32>
    %21 = arith.addf %19, %20 : vector<16x256xf32>
    %22 = arith.addf %21, %4 : vector<16x256xf32>
    %23 = arith.negf %22 : vector<16x256xf32>
    %24 = math.exp %23 : vector<16x256xf32>
    %cst_13 = arith.constant 1.000000e+00 : f32
    %25 = vector.broadcast %cst_13 : f32 to vector<16x256xf32>
    %26 = arith.addf %25, %24 : vector<16x256xf32>
    %27 = arith.divf %25, %26 : vector<16x256xf32>
    %28 = vector.extract_strided_slice %27 {offsets = [0, 0], sizes = [16, 128], strides = [1, 1]} : vector<16x256xf32> to vector<16x128xf32>
    %29 = vector.extract_strided_slice %27 {offsets = [0, 128], sizes = [16, 128], strides = [1, 1]} : vector<16x256xf32> to vector<16x128xf32>
    %30 = vector.extract_strided_slice %16 {offsets = [0, 256], sizes = [16, 128], strides = [1, 1]} : vector<16x384xf32> to vector<16x128xf32>
    %31 = arith.addf %30, %7 : vector<16x128xf32>
    %32 = vector.extract_strided_slice %18 {offsets = [0, 256], sizes = [16, 128], strides = [1, 1]} : vector<16x384xf32> to vector<16x128xf32>
    %33 = arith.addf %32, %10 : vector<16x128xf32>
    %34 = arith.mulf %28, %33 : vector<16x128xf32>
    %35 = arith.addf %31, %34 : vector<16x128xf32>
    %36 = math.tanh %35 : vector<16x128xf32>
    %cst_14 = arith.constant 1.000000e+00 : f32
    %37 = vector.broadcast %cst_14 : f32 to vector<16x128xf32>
    %38 = arith.subf %37, %29 : vector<16x128xf32>
    %39 = arith.mulf %38, %36 : vector<16x128xf32>
    %40 = arith.mulf %29, %11 : vector<16x128xf32>
    %41 = arith.addf %39, %40 : vector<16x128xf32>
    %c1_i32 = arith.constant 1 : i32
    %42 = arith.index_cast %c1_i32 : i32 to index
    %c0_15 = arith.constant 0 : index
    %c0_16 = arith.constant 0 : index
    %43 = vector.load %arg1[%42, %c0_15, %c0_16] : memref<6x16x16xf32, #tpu.memory_space<vmem>>, vector<1x16x16xf32>
    %44 = vector.shape_cast %43 : vector<1x16x16xf32> to vector<16x16xf32>
    %45 = arith.truncf %44 : vector<16x16xf32> to vector<16x16xbf16>
    %cst_17 = arith.constant dense<0.000000e+00> : vector<16x384xf32>
    %46 = tpu.matmul %45, %0, %cst_17 {dimension_numbers = #tpu.dot_dimension_numbers<[1], [0], [0], [1], [0, 0, 1, 1], [], []>} : vector<16x16xbf16>, vector<16x384xbf16>, vector<16x384xf32> -> vector<16x384xf32>
    %47 = arith.truncf %41 : vector<16x128xf32> to vector<16x128xbf16>
    %cst_18 = arith.constant dense<0.000000e+00> : vector<16x384xf32>
    %48 = tpu.matmul %47, %1, %cst_18 {dimension_numbers = #tpu.dot_dimension_numbers<[1], [0], [0], [1], [0, 0, 1, 1], [], []>} : vector<16x128xbf16>, vector<128x384xbf16>, vector<16x384xf32> -> vector<16x384xf32>
    %49 = vector.extract_strided_slice %46 {offsets = [0, 0], sizes = [16, 256], strides = [1, 1]} : vector<16x384xf32> to vector<16x256xf32>
    %50 = vector.extract_strided_slice %48 {offsets = [0, 0], sizes = [16, 256], strides = [1, 1]} : vector<16x384xf32> to vector<16x256xf32>
    %51 = arith.addf %49, %50 : vector<16x256xf32>
    %52 = arith.addf %51, %4 : vector<16x256xf32>
    %53 = arith.negf %52 : vector<16x256xf32>
    %54 = math.exp %53 : vector<16x256xf32>
    %cst_19 = arith.constant 1.000000e+00 : f32
    %55 = vector.broadcast %cst_19 : f32 to vector<16x256xf32>
    %56 = arith.addf %55, %54 : vector<16x256xf32>
    %57 = arith.divf %55, %56 : vector<16x256xf32>
    %58 = vector.extract_strided_slice %57 {offsets = [0, 0], sizes = [16, 128], strides = [1, 1]} : vector<16x256xf32> to vector<16x128xf32>
    %59 = vector.extract_strided_slice %57 {offsets = [0, 128], sizes = [16, 128], strides = [1, 1]} : vector<16x256xf32> to vector<16x128xf32>
    %60 = vector.extract_strided_slice %46 {offsets = [0, 256], sizes = [16, 128], strides = [1, 1]} : vector<16x384xf32> to vector<16x128xf32>
    %61 = arith.addf %60, %7 : vector<16x128xf32>
    %62 = vector.extract_strided_slice %48 {offsets = [0, 256], sizes = [16, 128], strides = [1, 1]} : vector<16x384xf32> to vector<16x128xf32>
    %63 = arith.addf %62, %10 : vector<16x128xf32>
    %64 = arith.mulf %58, %63 : vector<16x128xf32>
    %65 = arith.addf %61, %64 : vector<16x128xf32>
    %66 = math.tanh %65 : vector<16x128xf32>
    %cst_20 = arith.constant 1.000000e+00 : f32
    %67 = vector.broadcast %cst_20 : f32 to vector<16x128xf32>
    %68 = arith.subf %67, %59 : vector<16x128xf32>
    %69 = arith.mulf %68, %66 : vector<16x128xf32>
    %70 = arith.mulf %59, %41 : vector<16x128xf32>
    %71 = arith.addf %69, %70 : vector<16x128xf32>
    %c2_i32 = arith.constant 2 : i32
    %72 = arith.index_cast %c2_i32 : i32 to index
    %c0_21 = arith.constant 0 : index
    %c0_22 = arith.constant 0 : index
    %73 = vector.load %arg1[%72, %c0_21, %c0_22] : memref<6x16x16xf32, #tpu.memory_space<vmem>>, vector<1x16x16xf32>
    %74 = vector.shape_cast %73 : vector<1x16x16xf32> to vector<16x16xf32>
    %75 = arith.truncf %74 : vector<16x16xf32> to vector<16x16xbf16>
    %cst_23 = arith.constant dense<0.000000e+00> : vector<16x384xf32>
    %76 = tpu.matmul %75, %0, %cst_23 {dimension_numbers = #tpu.dot_dimension_numbers<[1], [0], [0], [1], [0, 0, 1, 1], [], []>} : vector<16x16xbf16>, vector<16x384xbf16>, vector<16x384xf32> -> vector<16x384xf32>
    %77 = arith.truncf %71 : vector<16x128xf32> to vector<16x128xbf16>
    %cst_24 = arith.constant dense<0.000000e+00> : vector<16x384xf32>
    %78 = tpu.matmul %77, %1, %cst_24 {dimension_numbers = #tpu.dot_dimension_numbers<[1], [0], [0], [1], [0, 0, 1, 1], [], []>} : vector<16x128xbf16>, vector<128x384xbf16>, vector<16x384xf32> -> vector<16x384xf32>
    %79 = vector.extract_strided_slice %76 {offsets = [0, 0], sizes = [16, 256], strides = [1, 1]} : vector<16x384xf32> to vector<16x256xf32>
    %80 = vector.extract_strided_slice %78 {offsets = [0, 0], sizes = [16, 256], strides = [1, 1]} : vector<16x384xf32> to vector<16x256xf32>
    %81 = arith.addf %79, %80 : vector<16x256xf32>
    %82 = arith.addf %81, %4 : vector<16x256xf32>
    %83 = arith.negf %82 : vector<16x256xf32>
    %84 = math.exp %83 : vector<16x256xf32>
    %cst_25 = arith.constant 1.000000e+00 : f32
    %85 = vector.broadcast %cst_25 : f32 to vector<16x256xf32>
    %86 = arith.addf %85, %84 : vector<16x256xf32>
    %87 = arith.divf %85, %86 : vector<16x256xf32>
    %88 = vector.extract_strided_slice %87 {offsets = [0, 0], sizes = [16, 128], strides = [1, 1]} : vector<16x256xf32> to vector<16x128xf32>
    %89 = vector.extract_strided_slice %87 {offsets = [0, 128], sizes = [16, 128], strides = [1, 1]} : vector<16x256xf32> to vector<16x128xf32>
    %90 = vector.extract_strided_slice %76 {offsets = [0, 256], sizes = [16, 128], strides = [1, 1]} : vector<16x384xf32> to vector<16x128xf32>
    %91 = arith.addf %90, %7 : vector<16x128xf32>
    %92 = vector.extract_strided_slice %78 {offsets = [0, 256], sizes = [16, 128], strides = [1, 1]} : vector<16x384xf32> to vector<16x128xf32>
    %93 = arith.addf %92, %10 : vector<16x128xf32>
    %94 = arith.mulf %88, %93 : vector<16x128xf32>
    %95 = arith.addf %91, %94 : vector<16x128xf32>
    %96 = math.tanh %95 : vector<16x128xf32>
    %cst_26 = arith.constant 1.000000e+00 : f32
    %97 = vector.broadcast %cst_26 : f32 to vector<16x128xf32>
    %98 = arith.subf %97, %89 : vector<16x128xf32>
    %99 = arith.mulf %98, %96 : vector<16x128xf32>
    %100 = arith.mulf %89, %71 : vector<16x128xf32>
    %101 = arith.addf %99, %100 : vector<16x128xf32>
    %c3_i32 = arith.constant 3 : i32
    %102 = arith.index_cast %c3_i32 : i32 to index
    %c0_27 = arith.constant 0 : index
    %c0_28 = arith.constant 0 : index
    %103 = vector.load %arg1[%102, %c0_27, %c0_28] : memref<6x16x16xf32, #tpu.memory_space<vmem>>, vector<1x16x16xf32>
    %104 = vector.shape_cast %103 : vector<1x16x16xf32> to vector<16x16xf32>
    %105 = arith.truncf %104 : vector<16x16xf32> to vector<16x16xbf16>
    %cst_29 = arith.constant dense<0.000000e+00> : vector<16x384xf32>
    %106 = tpu.matmul %105, %0, %cst_29 {dimension_numbers = #tpu.dot_dimension_numbers<[1], [0], [0], [1], [0, 0, 1, 1], [], []>} : vector<16x16xbf16>, vector<16x384xbf16>, vector<16x384xf32> -> vector<16x384xf32>
    %107 = arith.truncf %101 : vector<16x128xf32> to vector<16x128xbf16>
    %cst_30 = arith.constant dense<0.000000e+00> : vector<16x384xf32>
    %108 = tpu.matmul %107, %1, %cst_30 {dimension_numbers = #tpu.dot_dimension_numbers<[1], [0], [0], [1], [0, 0, 1, 1], [], []>} : vector<16x128xbf16>, vector<128x384xbf16>, vector<16x384xf32> -> vector<16x384xf32>
    %109 = vector.extract_strided_slice %106 {offsets = [0, 0], sizes = [16, 256], strides = [1, 1]} : vector<16x384xf32> to vector<16x256xf32>
    %110 = vector.extract_strided_slice %108 {offsets = [0, 0], sizes = [16, 256], strides = [1, 1]} : vector<16x384xf32> to vector<16x256xf32>
    %111 = arith.addf %109, %110 : vector<16x256xf32>
    %112 = arith.addf %111, %4 : vector<16x256xf32>
    %113 = arith.negf %112 : vector<16x256xf32>
    %114 = math.exp %113 : vector<16x256xf32>
    %cst_31 = arith.constant 1.000000e+00 : f32
    %115 = vector.broadcast %cst_31 : f32 to vector<16x256xf32>
    %116 = arith.addf %115, %114 : vector<16x256xf32>
    %117 = arith.divf %115, %116 : vector<16x256xf32>
    %118 = vector.extract_strided_slice %117 {offsets = [0, 0], sizes = [16, 128], strides = [1, 1]} : vector<16x256xf32> to vector<16x128xf32>
    %119 = vector.extract_strided_slice %117 {offsets = [0, 128], sizes = [16, 128], strides = [1, 1]} : vector<16x256xf32> to vector<16x128xf32>
    %120 = vector.extract_strided_slice %106 {offsets = [0, 256], sizes = [16, 128], strides = [1, 1]} : vector<16x384xf32> to vector<16x128xf32>
    %121 = arith.addf %120, %7 : vector<16x128xf32>
    %122 = vector.extract_strided_slice %108 {offsets = [0, 256], sizes = [16, 128], strides = [1, 1]} : vector<16x384xf32> to vector<16x128xf32>
    %123 = arith.addf %122, %10 : vector<16x128xf32>
    %124 = arith.mulf %118, %123 : vector<16x128xf32>
    %125 = arith.addf %121, %124 : vector<16x128xf32>
    %126 = math.tanh %125 : vector<16x128xf32>
    %cst_32 = arith.constant 1.000000e+00 : f32
    %127 = vector.broadcast %cst_32 : f32 to vector<16x128xf32>
    %128 = arith.subf %127, %119 : vector<16x128xf32>
    %129 = arith.mulf %128, %126 : vector<16x128xf32>
    %130 = arith.mulf %119, %101 : vector<16x128xf32>
    %131 = arith.addf %129, %130 : vector<16x128xf32>
    %c4_i32 = arith.constant 4 : i32
    %132 = arith.index_cast %c4_i32 : i32 to index
    %c0_33 = arith.constant 0 : index
    %c0_34 = arith.constant 0 : index
    %133 = vector.load %arg1[%132, %c0_33, %c0_34] : memref<6x16x16xf32, #tpu.memory_space<vmem>>, vector<1x16x16xf32>
    %134 = vector.shape_cast %133 : vector<1x16x16xf32> to vector<16x16xf32>
    %135 = arith.truncf %134 : vector<16x16xf32> to vector<16x16xbf16>
    %cst_35 = arith.constant dense<0.000000e+00> : vector<16x384xf32>
    %136 = tpu.matmul %135, %0, %cst_35 {dimension_numbers = #tpu.dot_dimension_numbers<[1], [0], [0], [1], [0, 0, 1, 1], [], []>} : vector<16x16xbf16>, vector<16x384xbf16>, vector<16x384xf32> -> vector<16x384xf32>
    %137 = arith.truncf %131 : vector<16x128xf32> to vector<16x128xbf16>
    %cst_36 = arith.constant dense<0.000000e+00> : vector<16x384xf32>
    %138 = tpu.matmul %137, %1, %cst_36 {dimension_numbers = #tpu.dot_dimension_numbers<[1], [0], [0], [1], [0, 0, 1, 1], [], []>} : vector<16x128xbf16>, vector<128x384xbf16>, vector<16x384xf32> -> vector<16x384xf32>
    %139 = vector.extract_strided_slice %136 {offsets = [0, 0], sizes = [16, 256], strides = [1, 1]} : vector<16x384xf32> to vector<16x256xf32>
    %140 = vector.extract_strided_slice %138 {offsets = [0, 0], sizes = [16, 256], strides = [1, 1]} : vector<16x384xf32> to vector<16x256xf32>
    %141 = arith.addf %139, %140 : vector<16x256xf32>
    %142 = arith.addf %141, %4 : vector<16x256xf32>
    %143 = arith.negf %142 : vector<16x256xf32>
    %144 = math.exp %143 : vector<16x256xf32>
    %cst_37 = arith.constant 1.000000e+00 : f32
    %145 = vector.broadcast %cst_37 : f32 to vector<16x256xf32>
    %146 = arith.addf %145, %144 : vector<16x256xf32>
    %147 = arith.divf %145, %146 : vector<16x256xf32>
    %148 = vector.extract_strided_slice %147 {offsets = [0, 0], sizes = [16, 128], strides = [1, 1]} : vector<16x256xf32> to vector<16x128xf32>
    %149 = vector.extract_strided_slice %147 {offsets = [0, 128], sizes = [16, 128], strides = [1, 1]} : vector<16x256xf32> to vector<16x128xf32>
    %150 = vector.extract_strided_slice %136 {offsets = [0, 256], sizes = [16, 128], strides = [1, 1]} : vector<16x384xf32> to vector<16x128xf32>
    %151 = arith.addf %150, %7 : vector<16x128xf32>
    %152 = vector.extract_strided_slice %138 {offsets = [0, 256], sizes = [16, 128], strides = [1, 1]} : vector<16x384xf32> to vector<16x128xf32>
    %153 = arith.addf %152, %10 : vector<16x128xf32>
    %154 = arith.mulf %148, %153 : vector<16x128xf32>
    %155 = arith.addf %151, %154 : vector<16x128xf32>
    %156 = math.tanh %155 : vector<16x128xf32>
    %cst_38 = arith.constant 1.000000e+00 : f32
    %157 = vector.broadcast %cst_38 : f32 to vector<16x128xf32>
    %158 = arith.subf %157, %149 : vector<16x128xf32>
    %159 = arith.mulf %158, %156 : vector<16x128xf32>
    %160 = arith.mulf %149, %131 : vector<16x128xf32>
    %161 = arith.addf %159, %160 : vector<16x128xf32>
    %c5_i32 = arith.constant 5 : i32
    %162 = arith.index_cast %c5_i32 : i32 to index
    %c0_39 = arith.constant 0 : index
    %c0_40 = arith.constant 0 : index
    %163 = vector.load %arg1[%162, %c0_39, %c0_40] : memref<6x16x16xf32, #tpu.memory_space<vmem>>, vector<1x16x16xf32>
    %164 = vector.shape_cast %163 : vector<1x16x16xf32> to vector<16x16xf32>
    %165 = arith.truncf %164 : vector<16x16xf32> to vector<16x16xbf16>
    %cst_41 = arith.constant dense<0.000000e+00> : vector<16x384xf32>
    %166 = tpu.matmul %165, %0, %cst_41 {dimension_numbers = #tpu.dot_dimension_numbers<[1], [0], [0], [1], [0, 0, 1, 1], [], []>} : vector<16x16xbf16>, vector<16x384xbf16>, vector<16x384xf32> -> vector<16x384xf32>
    %167 = arith.truncf %161 : vector<16x128xf32> to vector<16x128xbf16>
    %cst_42 = arith.constant dense<0.000000e+00> : vector<16x384xf32>
    %168 = tpu.matmul %167, %1, %cst_42 {dimension_numbers = #tpu.dot_dimension_numbers<[1], [0], [0], [1], [0, 0, 1, 1], [], []>} : vector<16x128xbf16>, vector<128x384xbf16>, vector<16x384xf32> -> vector<16x384xf32>
    %169 = vector.extract_strided_slice %166 {offsets = [0, 0], sizes = [16, 256], strides = [1, 1]} : vector<16x384xf32> to vector<16x256xf32>
    %170 = vector.extract_strided_slice %168 {offsets = [0, 0], sizes = [16, 256], strides = [1, 1]} : vector<16x384xf32> to vector<16x256xf32>
    %171 = arith.addf %169, %170 : vector<16x256xf32>
    %172 = arith.addf %171, %4 : vector<16x256xf32>
    %173 = arith.negf %172 : vector<16x256xf32>
    %174 = math.exp %173 : vector<16x256xf32>
    %cst_43 = arith.constant 1.000000e+00 : f32
    %175 = vector.broadcast %cst_43 : f32 to vector<16x256xf32>
    %176 = arith.addf %175, %174 : vector<16x256xf32>
    %177 = arith.divf %175, %176 : vector<16x256xf32>
    %178 = vector.extract_strided_slice %177 {offsets = [0, 0], sizes = [16, 128], strides = [1, 1]} : vector<16x256xf32> to vector<16x128xf32>
    %179 = vector.extract_strided_slice %177 {offsets = [0, 128], sizes = [16, 128], strides = [1, 1]} : vector<16x256xf32> to vector<16x128xf32>
    %180 = vector.extract_strided_slice %166 {offsets = [0, 256], sizes = [16, 128], strides = [1, 1]} : vector<16x384xf32> to vector<16x128xf32>
    %181 = arith.addf %180, %7 : vector<16x128xf32>
    %182 = vector.extract_strided_slice %168 {offsets = [0, 256], sizes = [16, 128], strides = [1, 1]} : vector<16x384xf32> to vector<16x128xf32>
    %183 = arith.addf %182, %10 : vector<16x128xf32>
    %184 = arith.mulf %178, %183 : vector<16x128xf32>
    %185 = arith.addf %181, %184 : vector<16x128xf32>
    %186 = math.tanh %185 : vector<16x128xf32>
    %cst_44 = arith.constant 1.000000e+00 : f32
    %187 = vector.broadcast %cst_44 : f32 to vector<16x128xf32>
    %188 = arith.subf %187, %179 : vector<16x128xf32>
    %189 = arith.mulf %188, %186 : vector<16x128xf32>
    %190 = arith.mulf %179, %161 : vector<16x128xf32>
    %191 = arith.addf %189, %190 : vector<16x128xf32>
    %c6_i32 = arith.constant 6 : i32
    %c0_45 = arith.constant 0 : index
    %c0_46 = arith.constant 0 : index
    %192 = vector.load %arg7[%c0_45, %c0_46] : memref<16x128xf32, #tpu.memory_space<vmem>>, vector<16x128xf32>
    tpu.vector_store %arg7[%c0_45, %c0_46], %191 {strides = array<i32>} : memref<16x128xf32, #tpu.memory_space<vmem>>, vector<16x128xf32>,
    return
  }
  func.func @transform_0(%arg0: i32) -> (i32, i32, i32) {
    %c0_i32 = arith.constant 0 : i32
    %c0_i32_0 = arith.constant 0 : i32
    %c0_i32_1 = arith.constant 0 : i32
    return %c0_i32, %arg0, %c0_i32_0 : i32, i32, i32
  }
  func.func @transform_1(%arg0: i32) -> (i32, i32) {
    %c0_i32 = arith.constant 0 : i32
    %c0_i32_0 = arith.constant 0 : i32
    %c0_i32_1 = arith.constant 0 : i32
    return %c0_i32, %c0_i32_0 : i32, i32
  }
  func.func @transform_2(%arg0: i32) -> (i32, i32) {
    %c0_i32 = arith.constant 0 : i32
    %c0_i32_0 = arith.constant 0 : i32
    %c0_i32_1 = arith.constant 0 : i32
    return %c0_i32, %c0_i32_0 : i32, i32
  }
  func.func @transform_3(%arg0: i32) -> (i32, i32) {
    %c0_i32 = arith.constant 0 : i32
    %c0_i32_0 = arith.constant 0 : i32
    %c0_i32_1 = arith.constant 0 : i32
    return %c0_i32, %c0_i32_0 : i32, i32
  }
  func.func @transform_4(%arg0: i32) -> (i32, i32) {
    %c0_i32 = arith.constant 0 : i32
    %c0_i32_0 = arith.constant 0 : i32
    %c0_i32_1 = arith.constant 0 : i32
    return %c0_i32, %c0_i32_0 : i32, i32
  }
  func.func @transform_5(%arg0: i32) -> (i32, i32) {
    %c0_i32 = arith.constant 0 : i32
    %c0_i32_0 = arith.constant 0 : i32
    %c0_i32_1 = arith.constant 0 : i32
    return %c0_i32, %c0_i32_0 : i32, i32
  }
  func.func @transform_6(%arg0: i32) -> (i32, i32) {
    %c0_i32 = arith.constant 0 : i32
    %c0_i32_0 = arith.constant 0 : i32
    return %arg0, %c0_i32 : i32, i32
  }
}

</mosaic_0001>

<bundles_post_ra>
// kernel: tpu_custom_call.1
= control target key start
LH: loop header
LB: loop body
LE: loop exit
PB: predicated region body
PF: predicated region fallthrough
CT: control target
= control target key end

     0   :  { %11 = vsyncpa [#allocation3], 0  ;;  %s2770_s0 = inlined_call_operand.hbm [shape: f32[6,16,16], index: 0, kind: input, shape index: {}]   ;;  %s2771_s1 = inlined_call_operand.hbm [shape: bf16[16,384], index: 1, kind: input, shape index: {}]   ;;  %s2772_s2 = inlined_call_operand.hbm [shape: bf16[128,384], index: 2, kind: input, shape index: {}]   ;;  %s2773_s3 = inlined_call_operand.vmem [shape: f32[1,256], index: 3, kind: input, shape index: {}]   ;;  %s2774_s4 = inlined_call_operand.vmem [shape: f32[1,128], index: 4, kind: input, shape index: {}]   ;;  %s2775_s5 = inlined_call_operand.vmem [shape: f32[1,128], index: 5, kind: input, shape index: {}]   ;;  %s2776_s6 = inlined_call_operand.hbm [shape: f32[16,128], index: 6, kind: output, shape index: {}]  }
   0x1   :  { %12 = vsyncpa [#allocation6], 0 }
   0x2   :  { %13 = vsyncpa [#allocation4], 0  ;;  %s2234_s21 = smov [#allocation5]   ;;  %s2140_s25 = scalar_lea.hbm %s2771_s1, 384 }
   0x3   :  { %s31_s22 = sshll.u32 %s2234_s21, 4  ;;  %p2141_p0 = scmp.ne.s32.totalorder %s2771_s1, %s2140_s25  ;;  %s32_s22 = int_to_ptr.vmem [resolvable:$true] %s31_s22 }
   0x4   :  { %p2144_p1 = scmp.lt.u32.totalorder %s2140_s25, %s2771_s1 }
   0x6   :  { %p2146_p2 = pnand %p2144_p1, %p2141_p0 }
   0x8   :  { %2149 = shalt.err (!%p2146_p2)
}
   0x9   :  { %s2150_s30 = scalar_lea.vmem %s32_s22, 384  ;;  %p2155_p4 = scmp.lt.s32.totalorder %s32_s22, %s32_s22 }
   0xa   :  { %p2151_p3 = scmp.ne.s32.totalorder %s32_s22, %s2150_s30  ;;  %p2156_p5 = scmp.lt.s32.totalorder %s2150_s30, %s2150_s30 }
   0xc   :  { %p2157_p6 = por %p2156_p5, %p2155_p4 }
   0xe   :  { %p2158_p7 = pnand %p2157_p6, %p2151_p3 }
  0x10   :  { %2161 = shalt.err (!%p2158_p7)
}
  0x11   :  { %s2235_s7 = smov 192   ;;  %s2236_s8 = smov 12  }
  0x12   :  { %37 = dma.hbm_to_vmem [thread:$0]  %s2771_s1, 384, %s32_s22, [#allocation6], %s2235_s7, %s2235_s7, %s2236_s8  }
  0x13   :  { %s2237_s11 = smov [#allocation2]   ;;  %s2162_s15 = scalar_lea.hbm %s2770_s0, 1536 }
  0x14   :  { %s19_s12 = sshll.u32 %s2237_s11, 4  ;;  %p2163_p8 = scmp.ne.s32.totalorder %s2770_s0, %s2162_s15  ;;  %s20_s12 = int_to_ptr.vmem [resolvable:$true] %s19_s12 }
  0x15   :  { %p2166_p9 = scmp.lt.u32.totalorder %s2162_s15, %s2770_s0 }
  0x17   :  { %p2168_p10 = pnand %p2166_p9, %p2163_p8 }
  0x19   :  { %2171 = shalt.err (!%p2168_p10)
}
  0x1a   :  { %s2172_s20 = scalar_lea.vmem %s20_s12, 1536  ;;  %p2177_p12 = scmp.lt.s32.totalorder %s20_s12, %s20_s12 }
  0x1b   :  { %p2173_p11 = scmp.ne.s32.totalorder %s20_s12, %s2172_s20  ;;  %p2178_p13 = scmp.lt.s32.totalorder %s2172_s20, %s2172_s20 }
  0x1d   :  { %p2179_p0 = por %p2178_p13, %p2177_p12 }
  0x1f   :  { %p2180_p1 = pnand %p2179_p0, %p2173_p11 }
  0x21   :  { %2183 = shalt.err (!%p2180_p1)
}
  0x22   :  { %s2238_s1 = smov 128   ;;  %s2239_s21 = smov 8  }
  0x23   :  { %25 = dma.hbm_to_vmem [thread:$0]  %s2770_s0, 1536, %s20_s12, [#allocation3], %s2238_s1, %s2238_s1, %s2239_s21  }
  0x24   :  { %s2240_s24 = smov [#allocation7]   ;;  %s2184_s28 = scalar_lea.hbm %s2772_s2, 3072 }
  0x25   :  { %s43_s25 = sshll.u32 %s2240_s24, 4  ;;  %p2185_p2 = scmp.ne.s32.totalorder %s2772_s2, %s2184_s28  ;;  %s44_s25 = int_to_ptr.vmem [resolvable:$true] %s43_s25 }
  0x26   :  { %p2188_p3 = scmp.lt.u32.totalorder %s2184_s28, %s2772_s2 }
  0x28   :  { %p2190_p4 = pnand %p2188_p3, %p2185_p2 }
  0x2a   :  { %2193 = shalt.err (!%p2190_p4)
}
  0x2b   :  { %s2194_s11 = scalar_lea.vmem %s44_s25, 3072  ;;  %p2199_p6 = scmp.lt.s32.totalorder %s44_s25, %s44_s25 }
  0x2c   :  { %p2195_p5 = scmp.ne.s32.totalorder %s44_s25, %s2194_s11  ;;  %p2200_p7 = scmp.lt.s32.totalorder %s2194_s11, %s2194_s11 }
  0x2e   :  { %p2201_p8 = por %p2200_p7, %p2199_p6 }
  0x30   :  { %p2202_p9 = pnand %p2201_p8, %p2195_p5 }
  0x32   :  { %2205 = shalt.err (!%p2202_p9)
}
  0x33   :  { %49 = dma.hbm_to_vmem [thread:$0]  %s2772_s2, 3072, %s44_s25, [#allocation6], %s2235_s7, %s2235_s7, %s2236_s8  }
  0x34   :  { %2228 = dma.done.wait [#allocation3], 1536  }
  0x35   :  { %2229 = vsyncadd [#allocation3], 4294965760 }
  0x36   :  { %2230 = dma.done.wait [#allocation6], 3456  }
  0x37   :  { %2231 = vsyncadd [#allocation6], 4294963840  ;;  %v2241_v0 = vmov 0   ;;  %v2242_v1 = vmov 0.0   ;;  %vm2243_vm0 = vmmov 0   ;;  %v128_v5 = vld [vmem:[#allocation2] sm:$0xff]  ;;  %v104_v39 = vlaneseq }
  0x38   :  { %183 = vmatprep.mubr.bf16.mxu0 %v2241_v0  ;;  %1778 = vmatprep.subr.bf16.mxu1 %v2242_v1  ;;  %v2329_v2 = vld [vmem:[#allocation5 + $0x4] ss:$12 sps:$4 sm:$0xff]   ;;  %v2331_v3 = vld [vmem:[#allocation5] ss:$12 sps:$4 sm:$0xff]   ;;  %v2334_v4 = vld [vmem:[#allocation7 + $0x4] ss:$12 sps:$4 sm:$0xff]  }
  0x39   :  { %1780 = vmatprep.mubr.msk.bf16.mxu1 %vm2243_vm0, %v2242_v1  ;;  %151 = vmatprep.subr.bf16.mxu0 %v2329_v2  ;;  %v129_v6 = vld [vmem:[#allocation2 + $0x8] sm:$0xff]  ;;  %vm147_vm1 = vcmask 130048   ;;  %v2337_v8 = vld [vmem:[#allocation7] ss:$12 sps:$4 sm:$0xff]   ;;  %v2340_v9 = vld [vmem:[#allocation7 + $0x1c] ss:$12 sps:$4 sm:$0xff]  }
  0x3a   :  { %152 = vmatpush1.bf16.msra.mxu0 %v2331_v3  ;;  %v130_v7 = vpack.c.bf16 %v129_v6, %v128_v5  ;;  %v2344_v10 = vld [vmem:[#allocation7 + $0x18] ss:$12 sps:$4 sm:$0xff]   ;;  %v2348_v11 = vld [vmem:[#allocation7 + $0x34] ss:$12 sps:$4 sm:$0xff]   ;;  %v2350_v12 = vld [vmem:[#allocation5 + $0x8] ss:$12 sps:$4 sm:$0xff]  }
  0x3b   :  { %363 = vmatprep.subr.bf16.mxu0 %v2334_v4  ;;  %v2352_v13 = vld [vmem:[#allocation7 + $0x30] ss:$12 sps:$4 sm:$0xff]   ;;  %v2355_v14 = vld [vmem:[#allocation7 + $0x4c] ss:$12 sps:$4 sm:$0xff]   ;;  %1779 = vmatpush3.bf16.msra.mxu1 %v2350_v12  ;;  %v2360_v15 = vld [vmem:[#allocation7 + $0x8] ss:$12 sps:$4 sm:$0xff]  }
  0x3c   :  { %1784 = vmatprep.subr.bf16.mxu1 %v2242_v1  ;;  %v2364_v16 = vld [vmem:[#allocation7 + $0x48] ss:$12 sps:$4 sm:$0xff]   ;;  %v2367_v17 = vld [vmem:[#allocation7 + $0x20] ss:$12 sps:$4 sm:$0xff]   ;;  %v2370_v18 = vld [vmem:[#allocation7 + $0x64] ss:$12 sps:$4 sm:$0xff]  }
  0x3d   :  { %1652 = vmatmul.mubr.msk.bf16.vlgmr.msra.gmra.mrb[0].mxu0 %vm147_vm1, %v130_v7  ;;  %v2375_v19 = vld [vmem:[#allocation7 + $0x60] ss:$12 sps:$4 sm:$0xff]   ;;  %v2379_v20 = vld [vmem:[#allocation7 + $0x38] ss:$12 sps:$4 sm:$0xff]   ;;  %v2382_v21 = vld [vmem:[#allocation7 + $0x7c] ss:$12 sps:$4 sm:$0xff]  }
  0x3e   :  { %364 = vmatpush1.bf16.msra.mxu0 %v2337_v8  ;;  %395 = vmatprep.mubr.bf16.mxu0 %v2241_v0  ;;  %v2386_v22 = vld [vmem:[#allocation7 + $0x78] ss:$12 sps:$4 sm:$0xff]   ;;  %v2389_v23 = vld [vmem:[#allocation7 + $0x50] ss:$12 sps:$4 sm:$0xff]   ;;  %v2392_v24 = vld [vmem:[#allocation7 + $0x94] ss:$12 sps:$4 sm:$0xff]  }
  0x3f   :  { %365 = vmatprep.subr.bf16.mxu0 %v2340_v9  ;;  %1781 = vmatmul.mubr.msk.bf16.vlgmr.msra.gmra.mrb[0].mxu1 %vm147_vm1, %v130_v7  ;;  %v2396_v25 = vld [vmem:[#allocation7 + $0x90] ss:$12 sps:$4 sm:$0xff]   ;;  %v2399_v26 = vld [vmem:[#allocation7 + $0x68] ss:$12 sps:$4 sm:$0xff]   ;;  %v2402_v27 = vld [vmem:[#allocation7 + $0xac] ss:$12 sps:$4 sm:$0xff]  }
  0x40   :  { %1785 = vmatpush3.bf16.msra.mxu1 %v2360_v15  ;;  %1800 = vmatprep.mubr.msk.bf16.mxu1 %vm2243_vm0, %v2242_v1  ;;  %v2406_v28 = vld [vmem:[#allocation7 + $0xa8] ss:$12 sps:$4 sm:$0xff]   ;;  %v2409_v29 = vld [vmem:[#allocation7 + $0x80] ss:$12 sps:$4 sm:$0xff]   ;;  %v2415_v30 = vld [vmem:[#allocation7 + $0x98] ss:$12 sps:$4 sm:$0xff]  }
  0x41   :  { %1786 = vmatprep.subr.bf16.mxu1 %v2242_v1  ;;  %v2421_v31 = vld [vmem:[#allocation7 + $0xb0] ss:$12 sps:$4 sm:$0xff]   ;;  %v499_v33 = vld [vmem:[#allocation2 + $0x18] sm:$0xff]  ;;  %v105_v40 = vshrl.u32 %v104_v39, 7  ;;  %v102_v42 = vld [vmem:[%s2773_s3] sm:$0x3] }
  0x42   :  { %366 = vmatpush1.bf16.msra.mxu0 %v2344_v10  ;;  %v498_v32 = vld [vmem:[#allocation2 + $0x10] sm:$0xff] }
  0x43   :  { %367 = vmatprep.subr.bf16.mxu0 %v2348_v11  ;;  %v500_v34 = vpack.c.bf16 %v499_v33, %v498_v32  ;;  %v106_v41 = vsub.s32 0, %v105_v40  ;;  %v110_v43 = vsub.s32 1, %v105_v40  ;;  %v2485_v32 = vld [vmem:[%s2775_s5] ss:$0 sm:$0xff] }
  0x44   :  { %1787 = vmatpush3.bf16.msra.mxu1 %v2367_v17 }
  0x45   :  { %1788 = vmatprep.subr.bf16.mxu1 %v2242_v1  ;;  %v2474_v44 = vrot.slane %v102_v42, %v106_v41  ;;  %v2476_v46 = vrot.slane %v102_v42, %v110_v43 }
  0x46   :  { %368 = vmatpush1.bf16.msra.mxu0 %v2352_v13 }
  0x47   :  { %369 = vmatprep.subr.bf16.mxu0 %v2355_v14 }
  0x48   :  { %1789 = vmatpush3.bf16.msra.mxu1 %v2379_v20 }
  0x49   :  { %1790 = vmatprep.subr.bf16.mxu1 %v2242_v1 }
  0x4a   :  { %370 = vmatpush1.bf16.msra.mxu0 %v2364_v16 }
  0x4b   :  { %371 = vmatprep.subr.bf16.mxu0 %v2370_v18 }
  0x4c   :  { %1791 = vmatpush3.bf16.msra.mxu1 %v2389_v23 }
  0x4d   :  { %1792 = vmatprep.subr.bf16.mxu1 %v2242_v1 }
  0x4e   :  { %372 = vmatpush1.bf16.msra.mxu0 %v2375_v19 }
  0x4f   :  { %373 = vmatprep.subr.bf16.mxu0 %v2382_v21 }
  0x50   :  { %1793 = vmatpush3.bf16.msra.mxu1 %v2399_v26 }
  0x51   :  { %1794 = vmatprep.subr.bf16.mxu1 %v2242_v1 }
  0x52   :  { %374 = vmatpush1.bf16.msra.mxu0 %v2386_v22 }
  0x53   :  { %375 = vmatprep.subr.bf16.mxu0 %v2392_v24 }
  0x54   :  { %1795 = vmatpush3.bf16.msra.mxu1 %v2409_v29 }
  0x55   :  { %1796 = vmatprep.subr.bf16.mxu1 %v2242_v1 }
  0x56   :  { %376 = vmatpush1.bf16.msra.mxu0 %v2396_v25 }
  0x57   :  { %377 = vmatprep.subr.bf16.mxu0 %v2402_v27 }
  0x58   :  { %1797 = vmatpush3.bf16.msra.mxu1 %v2415_v30 }
  0x59   :  { %1798 = vmatprep.subr.bf16.mxu1 %v2242_v1 }
  0x5a   :  { %378 = vmatpush1.bf16.msra.mxu0 %v2406_v28 }
  0x5b   :  { %504 = vmatprep.subr.bf16.mxu0 %v2329_v2 }
  0x5c   :  { %1799 = vmatpush3.bf16.msra.mxu1 %v2421_v31 }
  0x5d   :  { %396 = vmatmul.mubr.bf16.vlgmr.msra.gmra.mrb[0].mxu0 %v2241_v0  ;;  %1804 = vmatprep.subr.bf16.mxu1 %v2242_v1 }
  0x5e   :  { %505 = vmatpush1.bf16.msra.mxu0 %v2331_v3  ;;  %536 = vmatprep.mubr.bf16.mxu0 %v2241_v0 }
  0x5f   :  { %589 = vmatprep.subr.bf16.mxu0 %v2334_v4  ;;  %1801 = vmatmul.mubr.bf16.vlgmr.msra.gmra.mrb[4].mxu1 %v2241_v0 }
  0x60   :  { %1805 = vmatpush3.bf16.msra.mxu1 %v2350_v12  ;;  %1806 = vmatprep.mubr.msk.bf16.mxu1 %vm2243_vm0, %v2242_v1 }
  0x61   :  { %1810 = vmatprep.subr.bf16.mxu1 %v2242_v1 }
  0x65   :  { %1682 = vmatmul.mubr.msk.bf16.vlgmr.msra.gmra.mrb[4].mxu0 %vm147_vm1, %v500_v34 }
  0x66   :  { %590 = vmatpush1.bf16.msra.mxu0 %v2337_v8  ;;  %621 = vmatprep.mubr.bf16.mxu0 %v2241_v0 }
  0x67   :  { %1807 = vmatmul.mubr.msk.bf16.vlgmr.msra.gmra.mrb[8].mxu1 %vm147_vm1, %v500_v34  ;;  %591 = vmatprep.subr.bf16.mxu0 %v2340_v9 }
  0x68   :  { %1811 = vmatpush3.bf16.msra.mxu1 %v2360_v15  ;;  %1826 = vmatprep.mubr.msk.bf16.mxu1 %vm2243_vm0, %v2242_v1 }
  0x69   :  { %1812 = vmatprep.subr.bf16.mxu1 %v2242_v1 }
  0x6a   :  { %592 = vmatpush1.bf16.msra.mxu0 %v2344_v10 }
  0x6b   :  { %593 = vmatprep.subr.bf16.mxu0 %v2348_v11 }
  0x6c   :  { %1813 = vmatpush3.bf16.msra.mxu1 %v2367_v17 }
  0x6d   :  { %1814 = vmatprep.subr.bf16.mxu1 %v2242_v1 }
  0x6e   :  { %594 = vmatpush1.bf16.msra.mxu0 %v2352_v13 }
  0x6f   :  { %595 = vmatprep.subr.bf16.mxu0 %v2355_v14 }
  0x70   :  { %1815 = vmatpush3.bf16.msra.mxu1 %v2379_v20 }
  0x71   :  { %1816 = vmatprep.subr.bf16.mxu1 %v2242_v1 }
  0x72   :  { %596 = vmatpush1.bf16.msra.mxu0 %v2364_v16 }
  0x73   :  { %597 = vmatprep.subr.bf16.mxu0 %v2370_v18 }
  0x74   :  { %1817 = vmatpush3.bf16.msra.mxu1 %v2389_v23 }
  0x75   :  { %1818 = vmatprep.subr.bf16.mxu1 %v2242_v1 }
  0x76   :  { %598 = vmatpush1.bf16.msra.mxu0 %v2375_v19 }
  0x77   :  { %599 = vmatprep.subr.bf16.mxu0 %v2382_v21 }
  0x78   :  { %1819 = vmatpush3.bf16.msra.mxu1 %v2399_v26 }
  0x79   :  { %1820 = vmatprep.subr.bf16.mxu1 %v2242_v1 }
  0x7a   :  { %600 = vmatpush1.bf16.msra.mxu0 %v2386_v22 }
  0x7b   :  { %601 = vmatprep.subr.bf16.mxu0 %v2392_v24 }
  0x7c   :  { %1821 = vmatpush3.bf16.msra.mxu1 %v2409_v29 }
  0x7d   :  { %1822 = vmatprep.subr.bf16.mxu1 %v2242_v1 }
  0x7e   :  { %602 = vmatpush1.bf16.msra.mxu0 %v2396_v25 }
  0x7f   :  { %603 = vmatprep.subr.bf16.mxu0 %v2402_v27 }
  0x80   :  { %1823 = vmatpush3.bf16.msra.mxu1 %v2415_v30 }
  0x81   :  { %1824 = vmatprep.subr.bf16.mxu1 %v2242_v1 }
  0x82   :  { %604 = vmatpush1.bf16.msra.mxu0 %v2406_v28 }
  0x83   :  { %730 = vmatprep.subr.bf16.mxu0 %v2329_v2 }
  0x84   :  { %1825 = vmatpush3.bf16.msra.mxu1 %v2421_v31 }
  0x85   :  { %1830 = vmatprep.subr.bf16.mxu1 %v2242_v1 }
 0x112   :  { %v228_v35 = vpop.f32.mrb[0].mxu1 }
 0x113   :  { %v1782_v36 = vpop.f32.mrb[1].mxu1 }
 0x114   :  { %v231_v37 = vpop.f32.mrb[2].mxu1 }
 0x115   :  { %v1783_v38 = vpop.f32.mrb[3].mxu1 }
 0x116   :  { %v2491_v38 = vld [vmem:[%s2774_s4] ss:$0 sm:$0xff]  ;;  %s2244_s4 = smov [#allocation8]  }
 0x117   :  { %v479_v41 = vadd.f32 %v2491_v38, %v228_v35  ;;  %s1634_s5 = sshll.u32 %s2244_s4, 4  ;;  %s1635_s5 = int_to_ptr.vmem [resolvable:$true] %s1634_s5 }
 0x118   :  { %s2206_s15 = scalar_lea.vmem %s1635_s5, 256  ;;  %p2211_p11 = scmp.lt.s32.totalorder %s1635_s5, %s1635_s5 }
 0x119   :  { %p2207_p10 = scmp.ne.s32.totalorder %s1635_s5, %s2206_s15  ;;  %p2212_p12 = scmp.lt.s32.totalorder %s2206_s15, %s2206_s15 }
 0x11b   :  { %p2213_p13 = por %p2212_p12, %p2211_p11 }
 0x11d   :  { %p2214_p0 = pnand %p2213_p13, %p2207_p10 }
 0x130   :  { %v397_v45 = vpop.f32.mrb[0].mxu0 }
 0x131   :  { %v451_v47 = vadd.f32 %v397_v45, %v2474_v44  ;;  %v399_v48 = vpop.f32.mrb[1].mxu0 }
 0x132   :  { %v401_v49 = vpop.f32.mrb[2].mxu0  ;;  %v452_v53 = vadd.f32 %v399_v48, %v2476_v46  ;;  %v440_v57 = vpop.f32.mrb[4].mxu1 }
 0x133   :  { %v1678_v50 = vmul.f32 -1.442695, %v451_v47  ;;  %v453_v51 = vadd.f32 %v401_v49, %v2474_v44  ;;  %v403_v52 = vpop.f32.mrb[3].mxu0  ;;  %v1802_v58 = vpop.f32.mrb[5].mxu1  ;;  %v481_v36 = vadd.f32 %v2485_v32, %v440_v57  ;;  %v480_v47 = vadd.f32 %v2491_v38, %v231_v37 }
 0x134   :  { %v454_v55 = vadd.f32 %v403_v52, %v2476_v46  ;;  %v1679_v56 = vmul.f32 -1.442695, %v452_v53  ;;  %v443_v60 = vpop.f32.mrb[6].mxu1 }
 0x135   :  { %2005 = vpow2.f32 %v1678_v50  ;;  %v1680_v54 = vmul.f32 -1.442695, %v453_v51  ;;  %v1803_v61 = vpop.f32.mrb[7].mxu1  ;;  %v482_v43 = vadd.f32 %v2485_v32, %v443_v60 }
 0x136   :  { %v1681_v59 = vmul.f32 -1.442695, %v454_v55 }
 0x137   :  { %2007 = vpow2.f32 %v1680_v54 }
 0x138   :  { %2009 = vpow2.f32 %v1679_v56 }
 0x139   :  { %2011 = vpow2.f32 %v1681_v59 }
 0x13f   :  { %v2006_v62 = vpop.eup %2005 }
 0x140   :  { %v467_v63 = vadd.f32 1.0, %v2006_v62  ;;  %v2509_v62 = vpop.f32.mrb[8].mxu1 }
 0x141   :  { %v2008_v5 = vpop.eup %2007 }
 0x142   :  { %2013 = vrcp.f32 %v467_v63  ;;  %v469_v6 = vadd.f32 1.0, %v2008_v5  ;;  %v2010_v7 = vpop.eup %2009  ;;  %v1808_v63 = vpop.f32.mrb[9].mxu1 }
 0x143   :  { %v2012_v33 = vpop.eup %2011  ;;  %v468_v34 = vadd.f32 1.0, %v2010_v7  ;;  %v2511_v5 = vpop.f32.mrb[10].mxu1  ;;  %v724_v7 = vld [vmem:[#allocation2 + $0x20] sm:$0xff] }
 0x144   :  { %2015 = vrcp.f32 %v469_v6  ;;  %v470_v39 = vadd.f32 1.0, %v2012_v33  ;;  %v1809_v6 = vpop.f32.mrb[11].mxu1  ;;  %v725_v33 = vld [vmem:[#allocation2 + $0x28] sm:$0xff] }
 0x145   :  { %2017 = vrcp.f32 %v468_v34  ;;  %v726_v34 = vpack.c.bf16 %v725_v33, %v724_v7 }
 0x146   :  { %2019 = vrcp.f32 %v470_v39 }
 0x14c   :  { %v2014_v40 = vpop.eup %2013 }
 0x14d   :  { %v483_v42 = vmul.f32 %v2014_v40, %v481_v36 }
 0x14e   :  { %v2016_v45 = vpop.eup %2015 }
 0x14f   :  { %v485_v48 = vadd.f32 %v483_v42, %v479_v41  ;;  %v484_v49 = vmul.f32 %v2016_v45, %v482_v43  ;;  %v2018_v51 = vpop.eup %2017 }
 0x150   :  { %v2020_v52 = vpop.eup %2019  ;;  %v489_v53 = vsub.f32 1.0, %v2018_v51  ;;  %v493_v35 = vmul.f32 0.0, %v2018_v51 }
 0x151   :  { %2021 = vtanh.f32 %v485_v48  ;;  %v486_v50 = vadd.f32 %v484_v49, %v480_v47  ;;  %v490_v55 = vsub.f32 1.0, %v2020_v52  ;;  %v494_v59 = vmul.f32 0.0, %v2020_v52 }
 0x153   :  { %2023 = vtanh.f32 %v486_v50 }
 0x15b   :  { %v2022_v54 = vpop.eup %2021 }
 0x15c   :  { %v491_v56 = vmul.f32 %v2022_v54, %v489_v53 }
 0x15d   :  { %v2024_v57 = vpop.eup %2023 }
 0x15e   :  { %v492_v58 = vmul.f32 %v2024_v57, %v490_v55  ;;  %v2496_v60 = vadd.f32 %v493_v35, %v491_v56 }
 0x160   :  { %v2498_v61 = vadd.f32 %v494_v59, %v492_v58 }
 0x162   :  { %v588_v37 = vpack.c.bf16 %v2498_v61, %v2496_v60 }
 0x164   :  { %622 = vmatmul.mubr.bf16.vlgmr.msra.gmra.mrb[4].mxu0 %v588_v37  ;;  %1827 = vmatmul.mubr.bf16.vlgmr.msra.gmra.mrb[12].mxu1 %v588_v37 }
 0x165   :  { %731 = vmatpush1.bf16.msra.mxu0 %v2331_v3  ;;  %1831 = vmatpush3.bf16.msra.mxu1 %v2350_v12 }
 0x166   :  { %762 = vmatprep.mubr.bf16.mxu0 %v2241_v0  ;;  %1832 = vmatprep.mubr.msk.bf16.mxu1 %vm2243_vm0, %v2242_v1 }
 0x167   :  { %815 = vmatprep.subr.bf16.mxu0 %v2334_v4  ;;  %1836 = vmatprep.subr.bf16.mxu1 %v2242_v1 }
 0x16c   :  { %1688 = vmatmul.mubr.msk.bf16.vlgmr.msra.gmra.mrb[8].mxu0 %vm147_vm1, %v726_v34  ;;  %1833 = vmatmul.mubr.msk.bf16.vlgmr.msra.gmra.mrb[16].mxu1 %vm147_vm1, %v726_v34  ;;  %v705_v34 = vadd.f32 %v2491_v38, %v2509_v62 }
 0x16d   :  { %816 = vmatpush1.bf16.msra.mxu0 %v2337_v8  ;;  %1837 = vmatpush3.bf16.msra.mxu1 %v2360_v15 }
 0x16e   :  { %817 = vmatprep.subr.bf16.mxu0 %v2340_v9  ;;  %1838 = vmatprep.subr.bf16.mxu1 %v2242_v1 }
 0x16f   :  { %847 = vmatprep.mubr.bf16.mxu0 %v2241_v0  ;;  %1852 = vmatprep.mubr.msk.bf16.mxu1 %vm2243_vm0, %v2242_v1 }
 0x171   :  { %818 = vmatpush1.bf16.msra.mxu0 %v2344_v10  ;;  %1839 = vmatpush3.bf16.msra.mxu1 %v2367_v17 }
 0x172   :  { %819 = vmatprep.subr.bf16.mxu0 %v2348_v11  ;;  %1840 = vmatprep.subr.bf16.mxu1 %v2242_v1 }
 0x175   :  { %820 = vmatpush1.bf16.msra.mxu0 %v2352_v13  ;;  %1841 = vmatpush3.bf16.msra.mxu1 %v2379_v20 }
 0x176   :  { %821 = vmatprep.subr.bf16.mxu0 %v2355_v14  ;;  %1842 = vmatprep.subr.bf16.mxu1 %v2242_v1 }
 0x179   :  { %822 = vmatpush1.bf16.msra.mxu0 %v2364_v16  ;;  %1843 = vmatpush3.bf16.msra.mxu1 %v2389_v23 }
 0x17a   :  { %823 = vmatprep.subr.bf16.mxu0 %v2370_v18  ;;  %1844 = vmatprep.subr.bf16.mxu1 %v2242_v1 }
 0x17d   :  { %824 = vmatpush1.bf16.msra.mxu0 %v2375_v19  ;;  %1845 = vmatpush3.bf16.msra.mxu1 %v2399_v26 }
 0x17e   :  { %825 = vmatprep.subr.bf16.mxu0 %v2382_v21  ;;  %1846 = vmatprep.subr.bf16.mxu1 %v2242_v1 }
 0x181   :  { %826 = vmatpush1.bf16.msra.mxu0 %v2386_v22  ;;  %1847 = vmatpush3.bf16.msra.mxu1 %v2409_v29 }
 0x182   :  { %827 = vmatprep.subr.bf16.mxu0 %v2392_v24  ;;  %1848 = vmatprep.subr.bf16.mxu1 %v2242_v1 }
 0x185   :  { %828 = vmatpush1.bf16.msra.mxu0 %v2396_v25  ;;  %1849 = vmatpush3.bf16.msra.mxu1 %v2415_v30 }
 0x186   :  { %829 = vmatprep.subr.bf16.mxu0 %v2402_v27  ;;  %1850 = vmatprep.subr.bf16.mxu1 %v2242_v1 }
 0x189   :  { %830 = vmatpush1.bf16.msra.mxu0 %v2406_v28  ;;  %1851 = vmatpush3.bf16.msra.mxu1 %v2421_v31 }
 0x18a   :  { %956 = vmatprep.subr.bf16.mxu0 %v2329_v2  ;;  %1856 = vmatprep.subr.bf16.mxu1 %v2242_v1 }
 0x237   :  { %v623_v36 = vpop.f32.mrb[4].mxu0  ;;  %v666_v39 = vpop.f32.mrb[12].mxu1 }
 0x238   :  { %v677_v40 = vadd.f32 %v623_v36, %v2474_v44  ;;  %v625_v41 = vpop.f32.mrb[5].mxu0  ;;  %v1828_v42 = vpop.f32.mrb[13].mxu1  ;;  %v707_v6 = vadd.f32 %v2485_v32, %v666_v39 }
 0x239   :  { %v627_v43 = vpop.f32.mrb[6].mxu0  ;;  %v669_v45 = vpop.f32.mrb[14].mxu1  ;;  %v678_v51 = vadd.f32 %v625_v41, %v2476_v46  ;;  %v706_v42 = vadd.f32 %v2491_v38, %v2511_v5 }
 0x23a   :  { %v1684_v47 = vmul.f32 -1.442695, %v677_v40  ;;  %v679_v48 = vadd.f32 %v627_v43, %v2474_v44  ;;  %v629_v49 = vpop.f32.mrb[7].mxu0  ;;  %v1829_v50 = vpop.f32.mrb[15].mxu1  ;;  %v708_v40 = vadd.f32 %v2485_v32, %v669_v45 }
 0x23b   :  { %v680_v53 = vadd.f32 %v629_v49, %v2476_v46  ;;  %v1685_v54 = vmul.f32 -1.442695, %v678_v51 }
 0x23c   :  { %2025 = vpow2.f32 %v1684_v47  ;;  %v1686_v52 = vmul.f32 -1.442695, %v679_v48 }
 0x23d   :  { %v1687_v55 = vmul.f32 -1.442695, %v680_v53 }
 0x23e   :  { %2027 = vpow2.f32 %v1686_v52 }
 0x23f   :  { %2029 = vpow2.f32 %v1685_v54 }
 0x240   :  { %2031 = vpow2.f32 %v1687_v55 }
 0x246   :  { %v2026_v56 = vpop.eup %2025 }
 0x247   :  { %v693_v35 = vadd.f32 1.0, %v2026_v56 }
 0x248   :  { %v2028_v57 = vpop.eup %2027 }
 0x249   :  { %2033 = vrcp.f32 %v693_v35  ;;  %v695_v58 = vadd.f32 1.0, %v2028_v57  ;;  %v2030_v59 = vpop.eup %2029 }
 0x24a   :  { %v2032_v37 = vpop.eup %2031  ;;  %v694_v63 = vadd.f32 1.0, %v2030_v59  ;;  %v950_v59 = vld [vmem:[#allocation2 + $0x30] sm:$0xff] }
 0x24b   :  { %2035 = vrcp.f32 %v695_v58  ;;  %v696_v7 = vadd.f32 1.0, %v2032_v37  ;;  %v951_v37 = vld [vmem:[#allocation2 + $0x38] sm:$0xff] }
 0x24c   :  { %2037 = vrcp.f32 %v694_v63  ;;  %v952_v63 = vpack.c.bf16 %v951_v37, %v950_v59 }
 0x24d   :  { %2039 = vrcp.f32 %v696_v7 }
 0x253   :  { %v2034_v33 = vpop.eup %2033 }
 0x254   :  { %v709_v36 = vmul.f32 %v2034_v33, %v707_v6 }
 0x255   :  { %v2036_v41 = vpop.eup %2035 }
 0x256   :  { %v711_v43 = vadd.f32 %v709_v36, %v705_v34  ;;  %v710_v47 = vmul.f32 %v2036_v41, %v708_v40  ;;  %v2038_v39 = vpop.eup %2037 }
 0x257   :  { %v2040_v49 = vpop.eup %2039  ;;  %v715_v50 = vsub.f32 1.0, %v2038_v39  ;;  %v719_v53 = vmul.f32 %v2038_v39, %v2496_v60  ;;  %v2575_v60 = vpop.f32.mrb[16].mxu1 }
 0x258   :  { %2041 = vtanh.f32 %v711_v43  ;;  %v712_v48 = vadd.f32 %v710_v47, %v706_v42  ;;  %v716_v52 = vsub.f32 1.0, %v2040_v49  ;;  %v720_v55 = vmul.f32 %v2040_v49, %v2498_v61  ;;  %v1834_v61 = vpop.f32.mrb[17].mxu1 }
 0x259   :  { %v2577_v57 = vpop.f32.mrb[18].mxu1 }
 0x25a   :  { %2043 = vtanh.f32 %v712_v48  ;;  %v1835_v58 = vpop.f32.mrb[19].mxu1 }
 0x262   :  { %v2042_v51 = vpop.eup %2041 }
 0x263   :  { %v717_v62 = vmul.f32 %v2042_v51, %v715_v50 }
 0x264   :  { %v2044_v54 = vpop.eup %2043 }
 0x265   :  { %v718_v45 = vmul.f32 %v2044_v54, %v716_v52  ;;  %v2562_v56 = vadd.f32 %v719_v53, %v717_v62 }
 0x267   :  { %v2564_v5 = vadd.f32 %v720_v55, %v718_v45 }
 0x269   :  { %v814_v35 = vpack.c.bf16 %v2564_v5, %v2562_v56 }
 0x26b   :  { %848 = vmatmul.mubr.bf16.vlgmr.msra.gmra.mrb[8].mxu0 %v814_v35  ;;  %1853 = vmatmul.mubr.bf16.vlgmr.msra.gmra.mrb[20].mxu1 %v814_v35 }
 0x26c   :  { %957 = vmatpush1.bf16.msra.mxu0 %v2331_v3  ;;  %1857 = vmatpush3.bf16.msra.mxu1 %v2350_v12 }
 0x26d   :  { %988 = vmatprep.mubr.bf16.mxu0 %v2241_v0  ;;  %1858 = vmatprep.mubr.msk.bf16.mxu1 %vm2243_vm0, %v2242_v1 }
 0x26e   :  { %1041 = vmatprep.subr.bf16.mxu0 %v2334_v4  ;;  %1862 = vmatprep.subr.bf16.mxu1 %v2242_v1 }
 0x273   :  { %1694 = vmatmul.mubr.msk.bf16.vlgmr.msra.gmra.mrb[12].mxu0 %vm147_vm1, %v952_v63  ;;  %1859 = vmatmul.mubr.msk.bf16.vlgmr.msra.gmra.mrb[24].mxu1 %vm147_vm1, %v952_v63  ;;  %v931_v63 = vadd.f32 %v2491_v38, %v2575_v60 }
 0x274   :  { %1042 = vmatpush1.bf16.msra.mxu0 %v2337_v8  ;;  %1863 = vmatpush3.bf16.msra.mxu1 %v2360_v15 }
 0x275   :  { %1043 = vmatprep.subr.bf16.mxu0 %v2340_v9  ;;  %1864 = vmatprep.subr.bf16.mxu1 %v2242_v1 }
 0x276   :  { %1073 = vmatprep.mubr.bf16.mxu0 %v2241_v0  ;;  %1878 = vmatprep.mubr.msk.bf16.mxu1 %vm2243_vm0, %v2242_v1 }
 0x278   :  { %1044 = vmatpush1.bf16.msra.mxu0 %v2344_v10  ;;  %1865 = vmatpush3.bf16.msra.mxu1 %v2367_v17 }
 0x279   :  { %1045 = vmatprep.subr.bf16.mxu0 %v2348_v11  ;;  %1866 = vmatprep.subr.bf16.mxu1 %v2242_v1 }
 0x27c   :  { %1046 = vmatpush1.bf16.msra.mxu0 %v2352_v13  ;;  %1867 = vmatpush3.bf16.msra.mxu1 %v2379_v20 }
 0x27d   :  { %1047 = vmatprep.subr.bf16.mxu0 %v2355_v14  ;;  %1868 = vmatprep.subr.bf16.mxu1 %v2242_v1 }
 0x280   :  { %1048 = vmatpush1.bf16.msra.mxu0 %v2364_v16  ;;  %1869 = vmatpush3.bf16.msra.mxu1 %v2389_v23 }
 0x281   :  { %1049 = vmatprep.subr.bf16.mxu0 %v2370_v18  ;;  %1870 = vmatprep.subr.bf16.mxu1 %v2242_v1 }
 0x284   :  { %1050 = vmatpush1.bf16.msra.mxu0 %v2375_v19  ;;  %1871 = vmatpush3.bf16.msra.mxu1 %v2399_v26 }
 0x285   :  { %1051 = vmatprep.subr.bf16.mxu0 %v2382_v21  ;;  %1872 = vmatprep.subr.bf16.mxu1 %v2242_v1 }
 0x288   :  { %1052 = vmatpush1.bf16.msra.mxu0 %v2386_v22  ;;  %1873 = vmatpush3.bf16.msra.mxu1 %v2409_v29 }
 0x289   :  { %1053 = vmatprep.subr.bf16.mxu0 %v2392_v24  ;;  %1874 = vmatprep.subr.bf16.mxu1 %v2242_v1 }
 0x28c   :  { %1054 = vmatpush1.bf16.msra.mxu0 %v2396_v25  ;;  %1875 = vmatpush3.bf16.msra.mxu1 %v2415_v30 }
 0x28d   :  { %1055 = vmatprep.subr.bf16.mxu0 %v2402_v27  ;;  %1876 = vmatprep.subr.bf16.mxu1 %v2242_v1 }
 0x290   :  { %1056 = vmatpush1.bf16.msra.mxu0 %v2406_v28  ;;  %1877 = vmatpush3.bf16.msra.mxu1 %v2421_v31 }
 0x291   :  { %1182 = vmatprep.subr.bf16.mxu0 %v2329_v2  ;;  %1882 = vmatprep.subr.bf16.mxu1 %v2242_v1 }
 0x33e   :  { %v849_v6 = vpop.f32.mrb[8].mxu0  ;;  %v892_v7 = vpop.f32.mrb[20].mxu1 }
 0x33f   :  { %v903_v33 = vadd.f32 %v849_v6, %v2474_v44  ;;  %v851_v34 = vpop.f32.mrb[9].mxu0  ;;  %v1854_v36 = vpop.f32.mrb[21].mxu1  ;;  %v933_v58 = vadd.f32 %v2485_v32, %v892_v7 }
 0x340   :  { %v853_v40 = vpop.f32.mrb[10].mxu0  ;;  %v895_v41 = vpop.f32.mrb[22].mxu1  ;;  %v904_v39 = vadd.f32 %v851_v34, %v2476_v46  ;;  %v932_v36 = vadd.f32 %v2491_v38, %v2577_v57 }
 0x341   :  { %v1690_v42 = vmul.f32 -1.442695, %v903_v33  ;;  %v905_v43 = vadd.f32 %v853_v40, %v2474_v44  ;;  %v855_v47 = vpop.f32.mrb[11].mxu0  ;;  %v1855_v48 = vpop.f32.mrb[23].mxu1  ;;  %v934_v33 = vadd.f32 %v2485_v32, %v895_v41 }
 0x342   :  { %v906_v50 = vadd.f32 %v855_v47, %v2476_v46  ;;  %v1691_v51 = vmul.f32 -1.442695, %v904_v39 }
 0x343   :  { %2045 = vpow2.f32 %v1690_v42  ;;  %v1692_v49 = vmul.f32 -1.442695, %v905_v43 }
 0x344   :  { %v1693_v52 = vmul.f32 -1.442695, %v906_v50 }
 0x345   :  { %2047 = vpow2.f32 %v1692_v49 }
 0x346   :  { %2049 = vpow2.f32 %v1691_v51 }
 0x347   :  { %2051 = vpow2.f32 %v1693_v52 }
 0x34d   :  { %v2046_v62 = vpop.eup %2045 }
 0x34e   :  { %v919_v53 = vadd.f32 1.0, %v2046_v62 }
 0x34f   :  { %v2048_v54 = vpop.eup %2047 }
 0x350   :  { %2053 = vrcp.f32 %v919_v53  ;;  %v921_v45 = vadd.f32 1.0, %v2048_v54  ;;  %v2050_v55 = vpop.eup %2049 }
 0x351   :  { %v2052_v35 = vpop.eup %2051  ;;  %v920_v61 = vadd.f32 1.0, %v2050_v55  ;;  %v1176_v55 = vld [vmem:[#allocation2 + $0x40] sm:$0xff] }
 0x352   :  { %2055 = vrcp.f32 %v921_v45  ;;  %v922_v59 = vadd.f32 1.0, %v2052_v35  ;;  %v1177_v35 = vld [vmem:[#allocation2 + $0x48] sm:$0xff] }
 0x353   :  { %2057 = vrcp.f32 %v920_v61 }
 0x354   :  { %2059 = vrcp.f32 %v922_v59 }
 0x35a   :  { %v2054_v37 = vpop.eup %2053 }
 0x35b   :  { %v935_v6 = vmul.f32 %v2054_v37, %v933_v58 }
 0x35c   :  { %v2056_v34 = vpop.eup %2055 }
 0x35d   :  { %v937_v40 = vadd.f32 %v935_v6, %v931_v63  ;;  %v936_v42 = vmul.f32 %v2056_v34, %v934_v33  ;;  %v2058_v7 = vpop.eup %2057 }
 0x35e   :  { %v2060_v47 = vpop.eup %2059  ;;  %v941_v48 = vsub.f32 1.0, %v2058_v7  ;;  %v945_v50 = vmul.f32 %v2058_v7, %v2562_v56  ;;  %v2641_v56 = vpop.f32.mrb[24].mxu1 }
 0x35f   :  { %2061 = vtanh.f32 %v937_v40  ;;  %v938_v43 = vadd.f32 %v936_v42, %v932_v36  ;;  %v942_v49 = vsub.f32 1.0, %v2060_v47  ;;  %v946_v52 = vmul.f32 %v2060_v47, %v2564_v5  ;;  %v1860_v5 = vpop.f32.mrb[25].mxu1 }
 0x360   :  { %v2643_v54 = vpop.f32.mrb[26].mxu1 }
 0x361   :  { %2063 = vtanh.f32 %v938_v43  ;;  %v1861_v45 = vpop.f32.mrb[27].mxu1  ;;  %v1157_v43 = vadd.f32 %v2491_v38, %v2641_v56 }
 0x369   :  { %v2062_v39 = vpop.eup %2061 }
 0x36a   :  { %v943_v60 = vmul.f32 %v2062_v39, %v941_v48  ;;  %v1158_v39 = vadd.f32 %v2491_v38, %v2643_v54 }
 0x36b   :  { %v2064_v51 = vpop.eup %2063 }
 0x36c   :  { %v944_v41 = vmul.f32 %v2064_v51, %v942_v49  ;;  %v2628_v62 = vadd.f32 %v945_v50, %v943_v60 }
 0x36e   :  { %v2630_v57 = vadd.f32 %v946_v52, %v944_v41 }
 0x370   :  { %v1040_v53 = vpack.c.bf16 %v2630_v57, %v2628_v62 }
 0x372   :  { %1074 = vmatmul.mubr.bf16.vlgmr.msra.gmra.mrb[12].mxu0 %v1040_v53  ;;  %1879 = vmatmul.mubr.bf16.vlgmr.msra.gmra.mrb[28].mxu1 %v1040_v53 }
 0x373   :  { %1183 = vmatpush1.bf16.msra.mxu0 %v2331_v3  ;;  %1883 = vmatpush3.bf16.msra.mxu1 %v2350_v12  ;;  %v1178_v3 = vpack.c.bf16 %v1177_v35, %v1176_v55 }
 0x374   :  { %1214 = vmatprep.mubr.bf16.mxu0 %v2241_v0  ;;  %1884 = vmatprep.mubr.msk.bf16.mxu1 %vm2243_vm0, %v2242_v1 }
 0x375   :  { %1267 = vmatprep.subr.bf16.mxu0 %v2334_v4  ;;  %1888 = vmatprep.subr.bf16.mxu1 %v2242_v1 }
 0x37a   :  { %1700 = vmatmul.mubr.msk.bf16.vlgmr.msra.gmra.mrb[16].mxu0 %vm147_vm1, %v1178_v3  ;;  %1885 = vmatmul.mubr.msk.bf16.vlgmr.msra.gmra.mrb[32].mxu1 %vm147_vm1, %v1178_v3 }
 0x37b   :  { %1268 = vmatpush1.bf16.msra.mxu0 %v2337_v8  ;;  %1889 = vmatpush3.bf16.msra.mxu1 %v2360_v15 }
 0x37c   :  { %1269 = vmatprep.subr.bf16.mxu0 %v2340_v9  ;;  %1890 = vmatprep.subr.bf16.mxu1 %v2242_v1 }
 0x37d   :  { %1299 = vmatprep.mubr.bf16.mxu0 %v2241_v0  ;;  %1904 = vmatprep.mubr.msk.bf16.mxu1 %vm2243_vm0, %v2242_v1 }
 0x37f   :  { %1270 = vmatpush1.bf16.msra.mxu0 %v2344_v10  ;;  %1891 = vmatpush3.bf16.msra.mxu1 %v2367_v17 }
 0x380   :  { %1271 = vmatprep.subr.bf16.mxu0 %v2348_v11  ;;  %1892 = vmatprep.subr.bf16.mxu1 %v2242_v1 }
 0x383   :  { %1272 = vmatpush1.bf16.msra.mxu0 %v2352_v13  ;;  %1893 = vmatpush3.bf16.msra.mxu1 %v2379_v20 }
 0x384   :  { %1273 = vmatprep.subr.bf16.mxu0 %v2355_v14  ;;  %1894 = vmatprep.subr.bf16.mxu1 %v2242_v1 }
 0x387   :  { %1274 = vmatpush1.bf16.msra.mxu0 %v2364_v16  ;;  %1895 = vmatpush3.bf16.msra.mxu1 %v2389_v23 }
 0x388   :  { %1275 = vmatprep.subr.bf16.mxu0 %v2370_v18  ;;  %1896 = vmatprep.subr.bf16.mxu1 %v2242_v1 }
 0x38b   :  { %1276 = vmatpush1.bf16.msra.mxu0 %v2375_v19  ;;  %1897 = vmatpush3.bf16.msra.mxu1 %v2399_v26 }
 0x38c   :  { %1277 = vmatprep.subr.bf16.mxu0 %v2382_v21  ;;  %1898 = vmatprep.subr.bf16.mxu1 %v2242_v1 }
 0x38f   :  { %1278 = vmatpush1.bf16.msra.mxu0 %v2386_v22  ;;  %1899 = vmatpush3.bf16.msra.mxu1 %v2409_v29 }
 0x390   :  { %1279 = vmatprep.subr.bf16.mxu0 %v2392_v24  ;;  %1900 = vmatprep.subr.bf16.mxu1 %v2242_v1 }
 0x393   :  { %1280 = vmatpush1.bf16.msra.mxu0 %v2396_v25  ;;  %1901 = vmatpush3.bf16.msra.mxu1 %v2415_v30 }
 0x394   :  { %1281 = vmatprep.subr.bf16.mxu0 %v2402_v27  ;;  %1902 = vmatprep.subr.bf16.mxu1 %v2242_v1 }
 0x397   :  { %1282 = vmatpush1.bf16.msra.mxu0 %v2406_v28  ;;  %1903 = vmatpush3.bf16.msra.mxu1 %v2421_v31 }
 0x398   :  { %1408 = vmatprep.subr.bf16.mxu0 %v2329_v2  ;;  %1908 = vmatprep.subr.bf16.mxu1 %v2242_v1 }
 0x445   :  { %v1075_v4 = vpop.f32.mrb[12].mxu0  ;;  %v1118_v8 = vpop.f32.mrb[28].mxu1 }
 0x446   :  { %v1129_v9 = vadd.f32 %v1075_v4, %v2474_v44  ;;  %v1077_v10 = vpop.f32.mrb[13].mxu0  ;;  %v1880_v11 = vpop.f32.mrb[29].mxu1  ;;  %v1159_v36 = vadd.f32 %v2485_v32, %v1118_v8 }
 0x447   :  { %v1079_v12 = vpop.f32.mrb[14].mxu0  ;;  %v1121_v13 = vpop.f32.mrb[30].mxu1  ;;  %v1130_v18 = vadd.f32 %v1077_v10, %v2476_v46  ;;  %v2126_v10 = vld [vmem:[#allocation5 + $0x8] ss:$12 sps:$4 sm:$0xff]  }
 0x448   :  { %v1696_v14 = vmul.f32 -1.442695, %v1129_v9  ;;  %v1131_v15 = vadd.f32 %v1079_v12, %v2474_v44  ;;  %v1081_v16 = vpop.f32.mrb[15].mxu0  ;;  %v1881_v17 = vpop.f32.mrb[31].mxu1  ;;  %v1160_v47 = vadd.f32 %v2485_v32, %v1121_v13  ;;  %v2125_v9 = vld [vmem:[#allocation5] ss:$12 sps:$4 sm:$0xff]  }
 0x449   :  { %v1132_v2 = vadd.f32 %v1081_v16, %v2476_v46  ;;  %v1697_v21 = vmul.f32 -1.442695, %v1130_v18  ;;  %v2128_v17 = vld [vmem:[#allocation7] ss:$12 sps:$4 sm:$0xff]   ;;  %v2129_v18 = vld [vmem:[#allocation7 + $0x8] ss:$12 sps:$4 sm:$0xff]  }
 0x44a   :  { %2065 = vpow2.f32 %v1696_v14  ;;  %v1698_v19 = vmul.f32 -1.442695, %v1131_v15  ;;  %v1402_v14 = vld [vmem:[#allocation2 + $0x50] sm:$0xff]  ;;  %v1403_v15 = vld [vmem:[#allocation2 + $0x58] sm:$0xff] }
 0x44b   :  { %v1699_v61 = vmul.f32 -1.442695, %v1132_v2  ;;  %v1404_v16 = vpack.c.bf16 %v1403_v15, %v1402_v14  ;;  %v2131_v2 = vld [vmem:[#allocation7 + $0x18] ss:$12 sps:$4 sm:$0xff]  }
 0x44c   :  { %2067 = vpow2.f32 %v1698_v19  ;;  %v2130_v19 = vld [vmem:[#allocation7 + $0x1c] ss:$12 sps:$4 sm:$0xff]  }
 0x44d   :  { %2069 = vpow2.f32 %v1697_v21  ;;  %v2132_v21 = vld [vmem:[#allocation7 + $0x20] ss:$12 sps:$4 sm:$0xff]  }
 0x44e   :  { %2071 = vpow2.f32 %v1699_v61  ;;  %v2133_v61 = vld [vmem:[#allocation7 + $0x34] ss:$12 sps:$4 sm:$0xff]  }
 0x454   :  { %v2066_v58 = vpop.eup %2065 }
 0x455   :  { %v1145_v59 = vadd.f32 1.0, %v2066_v58  ;;  %v2134_v58 = vld [vmem:[#allocation7 + $0x30] ss:$12 sps:$4 sm:$0xff]  }
 0x456   :  { %v2068_v37 = vpop.eup %2067 }
 0x457   :  { %2073 = vrcp.f32 %v1145_v59  ;;  %v1147_v63 = vadd.f32 1.0, %v2068_v37  ;;  %v2070_v6 = vpop.eup %2069  ;;  %v2135_v59 = vld [vmem:[#allocation7 + $0x4c] ss:$12 sps:$4 sm:$0xff]   ;;  %v2137_v37 = vld [vmem:[#allocation7 + $0x64] ss:$12 sps:$4 sm:$0xff]  }
 0x458   :  { %v2072_v33 = vpop.eup %2071  ;;  %v1146_v34 = vadd.f32 1.0, %v2070_v6  ;;  %v2139_v6 = vld [vmem:[#allocation7 + $0x7c] ss:$12 sps:$4 sm:$0xff]  }
 0x459   :  { %2075 = vrcp.f32 %v1147_v63  ;;  %v1148_v40 = vadd.f32 1.0, %v2072_v33  ;;  %v2138_v63 = vld [vmem:[#allocation7 + $0x60] ss:$12 sps:$4 sm:$0xff]  }
 0x45a   :  { %2077 = vrcp.f32 %v1146_v34 }
 0x45b   :  { %2079 = vrcp.f32 %v1148_v40 }
 0x461   :  { %v2074_v42 = vpop.eup %2073 }
 0x462   :  { %v1161_v7 = vmul.f32 %v2074_v42, %v1159_v36 }
 0x463   :  { %v2076_v48 = vpop.eup %2075 }
 0x464   :  { %v1163_v49 = vadd.f32 %v1161_v7, %v1157_v43  ;;  %v1162_v60 = vmul.f32 %v2076_v48, %v1160_v47  ;;  %v2078_v51 = vpop.eup %2077 }
 0x465   :  { %v2080_v41 = vpop.eup %2079  ;;  %v1167_v52 = vsub.f32 1.0, %v2078_v51  ;;  %v1171_v45 = vmul.f32 %v2078_v51, %v2628_v62  ;;  %v2127_v62 = vld [vmem:[#allocation7 + $0x4] ss:$12 sps:$4 sm:$0xff]  }
 0x466   :  { %2081 = vtanh.f32 %v1163_v49  ;;  %v1164_v50 = vadd.f32 %v1162_v60, %v1158_v39  ;;  %v1168_v5 = vsub.f32 1.0, %v2080_v41  ;;  %v1172_v3 = vmul.f32 %v2080_v41, %v2630_v57  ;;  %v2704_v57 = vpop.f32.mrb[32].mxu1 }
 0x467   :  { %v1886_v11 = vpop.f32.mrb[33].mxu1  ;;  %v1383_v41 = vadd.f32 %v2491_v38, %v2704_v57 }
 0x468   :  { %2083 = vtanh.f32 %v1164_v50  ;;  %v2706_v12 = vpop.f32.mrb[34].mxu1 }
 0x469   :  { %v1887_v13 = vpop.f32.mrb[35].mxu1 }
 0x470   :  { %v2082_v53 = vpop.eup %2081 }
 0x471   :  { %v1169_v56 = vmul.f32 %v2082_v53, %v1167_v52 }
 0x472   :  { %v2084_v55 = vpop.eup %2083 }
 0x473   :  { %v1170_v35 = vmul.f32 %v2084_v55, %v1168_v5  ;;  %v2694_v4 = vadd.f32 %v1171_v45, %v1169_v56  ;;  %v1384_v56 = vadd.f32 %v2491_v38, %v2706_v12 }
 0x475   :  { %v2696_v54 = vadd.f32 %v1172_v3, %v1170_v35 }
 0x477   :  { %v1266_v8 = vpack.c.bf16 %v2696_v54, %v2694_v4 }
 0x479   :  { %1300 = vmatmul.mubr.bf16.vlgmr.msra.gmra.mrb[16].mxu0 %v1266_v8  ;;  %1905 = vmatmul.mubr.bf16.vlgmr.msra.gmra.mrb[36].mxu1 %v1266_v8 }
 0x47a   :  { %1409 = vmatpush1.bf16.msra.mxu0 %v2125_v9  ;;  %1909 = vmatpush3.bf16.msra.mxu1 %v2126_v10 }
 0x47b   :  { %1440 = vmatprep.mubr.bf16.mxu0 %v2241_v0  ;;  %1910 = vmatprep.mubr.msk.bf16.mxu1 %vm2243_vm0, %v2242_v1 }
 0x47c   :  { %1493 = vmatprep.subr.bf16.mxu0 %v2127_v62  ;;  %1914 = vmatprep.subr.bf16.mxu1 %v2242_v1 }
 0x481   :  { %1706 = vmatmul.mubr.msk.bf16.vlgmr.msra.gmra.mrb[20].mxu0 %vm147_vm1, %v1404_v16  ;;  %1911 = vmatmul.mubr.msk.bf16.vlgmr.msra.gmra.mrb[40].mxu1 %vm147_vm1, %v1404_v16 }
 0x482   :  { %1494 = vmatpush1.bf16.msra.mxu0 %v2128_v17  ;;  %1915 = vmatpush3.bf16.msra.mxu1 %v2129_v18 }
 0x483   :  { %1495 = vmatprep.subr.bf16.mxu0 %v2130_v19  ;;  %1916 = vmatprep.subr.bf16.mxu1 %v2242_v1 }
 0x484   :  { %1525 = vmatprep.mubr.bf16.mxu0 %v2241_v0  ;;  %1930 = vmatprep.mubr.msk.bf16.mxu1 %vm2243_vm0, %v2242_v1  ;;  %v2136_v0 = vld [vmem:[#allocation7 + $0x48] ss:$12 sps:$4 sm:$0xff]  }
 0x486   :  { %1496 = vmatpush1.bf16.msra.mxu0 %v2131_v2  ;;  %1917 = vmatpush3.bf16.msra.mxu1 %v2132_v21 }
 0x487   :  { %1497 = vmatprep.subr.bf16.mxu0 %v2133_v61  ;;  %1918 = vmatprep.subr.bf16.mxu1 %v2242_v1 }
 0x48a   :  { %1498 = vmatpush1.bf16.msra.mxu0 %v2134_v58  ;;  %1919 = vmatpush3.bf16.msra.mxu1 %v2379_v20 }
 0x48b   :  { %1499 = vmatprep.subr.bf16.mxu0 %v2135_v59  ;;  %1920 = vmatprep.subr.bf16.mxu1 %v2242_v1 }
 0x48e   :  { %1500 = vmatpush1.bf16.msra.mxu0 %v2136_v0  ;;  %1921 = vmatpush3.bf16.msra.mxu1 %v2389_v23 }
 0x48f   :  { %1501 = vmatprep.subr.bf16.mxu0 %v2137_v37  ;;  %1922 = vmatprep.subr.bf16.mxu1 %v2242_v1 }
 0x492   :  { %1502 = vmatpush1.bf16.msra.mxu0 %v2138_v63  ;;  %1923 = vmatpush3.bf16.msra.mxu1 %v2399_v26 }
 0x493   :  { %1503 = vmatprep.subr.bf16.mxu0 %v2139_v6  ;;  %1924 = vmatprep.subr.bf16.mxu1 %v2242_v1 }
 0x496   :  { %1504 = vmatpush1.bf16.msra.mxu0 %v2386_v22  ;;  %1925 = vmatpush3.bf16.msra.mxu1 %v2409_v29 }
 0x497   :  { %1505 = vmatprep.subr.bf16.mxu0 %v2392_v24  ;;  %1926 = vmatprep.subr.bf16.mxu1 %v2242_v1 }
 0x49a   :  { %1506 = vmatpush1.bf16.msra.mxu0 %v2396_v25  ;;  %1927 = vmatpush3.bf16.msra.mxu1 %v2415_v30 }
 0x49b   :  { %1507 = vmatprep.subr.bf16.mxu0 %v2402_v27  ;;  %1928 = vmatprep.subr.bf16.mxu1 %v2242_v1 }
 0x49e   :  { %1508 = vmatpush1.bf16.msra.mxu0 %v2406_v28  ;;  %1929 = vmatpush3.bf16.msra.mxu1 %v2421_v31 }
 0x54c   :  { %v1301_v20 = vpop.f32.mrb[16].mxu0  ;;  %v1344_v22 = vpop.f32.mrb[36].mxu1 }
 0x54d   :  { %v1355_v23 = vadd.f32 %v1301_v20, %v2474_v44  ;;  %v1303_v26 = vpop.f32.mrb[17].mxu0  ;;  %v1906_v24 = vpop.f32.mrb[37].mxu1  ;;  %v1385_v60 = vadd.f32 %v2485_v32, %v1344_v22 }
 0x54e   :  { %v1305_v29 = vpop.f32.mrb[18].mxu0  ;;  %v1347_v33 = vpop.f32.mrb[38].mxu1  ;;  %v1356_v27 = vadd.f32 %v1303_v26, %v2476_v46 }
 0x54f   :  { %v1702_v34 = vmul.f32 -1.442695, %v1355_v23  ;;  %v1357_v25 = vadd.f32 %v1305_v29, %v2474_v44  ;;  %v1307_v30 = vpop.f32.mrb[19].mxu0  ;;  %v1907_v36 = vpop.f32.mrb[39].mxu1  ;;  %v1386_v53 = vadd.f32 %v2485_v32, %v1347_v33 }
 0x550   :  { %v1358_v28 = vadd.f32 %v1307_v30, %v2476_v46  ;;  %v1703_v31 = vmul.f32 -1.442695, %v1356_v27 }
 0x551   :  { %2085 = vpow2.f32 %v1702_v34  ;;  %v1704_v1 = vmul.f32 -1.442695, %v1357_v25 }
 0x552   :  { %v1705_v40 = vmul.f32 -1.442695, %v1358_v28 }
 0x553   :  { %2087 = vpow2.f32 %v1704_v1 }
 0x554   :  { %2089 = vpow2.f32 %v1703_v31  ;;  %v1485_v18 = vpop.f32.mrb[40].mxu1 }
 0x555   :  { %2091 = vpow2.f32 %v1705_v40  ;;  %v1912_v19 = vpop.f32.mrb[41].mxu1 }
 0x556   :  { %v1488_v2 = vpop.f32.mrb[42].mxu1 }
 0x557   :  { %v1913_v21 = vpop.f32.mrb[43].mxu1 }
 0x55b   :  { %v2086_v42 = vpop.eup %2085 }
 0x55c   :  { %v1371_v43 = vadd.f32 1.0, %v2086_v42 }
 0x55d   :  { %v2088_v7 = vpop.eup %2087 }
 0x55e   :  { %2093 = vrcp.f32 %v1371_v43  ;;  %v1373_v47 = vadd.f32 1.0, %v2088_v7  ;;  %v2090_v48 = vpop.eup %2089 }
 0x55f   :  { %v2092_v39 = vpop.eup %2091  ;;  %v1372_v49 = vadd.f32 1.0, %v2090_v48 }
 0x560   :  { %2095 = vrcp.f32 %v1373_v47  ;;  %v1374_v50 = vadd.f32 1.0, %v2092_v39  ;;  %v1610_v47 = vadd.f32 %v2491_v38, %v1488_v2 }
 0x561   :  { %2097 = vrcp.f32 %v1372_v49 }
 0x562   :  { %2099 = vrcp.f32 %v1374_v50 }
 0x568   :  { %v2094_v51 = vpop.eup %2093 }
 0x569   :  { %v1387_v52 = vmul.f32 %v2094_v51, %v1385_v60 }
 0x56a   :  { %v2096_v5 = vpop.eup %2095 }
 0x56b   :  { %v1389_v45 = vadd.f32 %v1387_v52, %v1383_v41  ;;  %v1388_v55 = vmul.f32 %v2096_v5, %v1386_v53  ;;  %v2098_v3 = vpop.eup %2097 }
 0x56c   :  { %v2100_v8 = vpop.eup %2099  ;;  %v1393_v9 = vsub.f32 1.0, %v2098_v3  ;;  %v1397_v11 = vmul.f32 %v2098_v3, %v2694_v4 }
 0x56d   :  { %2101 = vtanh.f32 %v1389_v45  ;;  %v1390_v35 = vadd.f32 %v1388_v55, %v1384_v56  ;;  %v1394_v62 = vsub.f32 1.0, %v2100_v8  ;;  %v1398_v15 = vmul.f32 %v2100_v8, %v2696_v54 }
 0x56f   :  { %2103 = vtanh.f32 %v1390_v35 }
 0x577   :  { %v2102_v10 = vpop.eup %2101 }
 0x578   :  { %v1395_v57 = vmul.f32 %v2102_v10, %v1393_v9 }
 0x579   :  { %v2104_v13 = vpop.eup %2103 }
 0x57a   :  { %v1396_v14 = vmul.f32 %v2104_v13, %v1394_v62  ;;  %v1399_v16 = vadd.f32 %v1397_v11, %v1395_v57 }
 0x57c   :  { %v2743_v12 = vadd.f32 %v1398_v15, %v1396_v14 }
 0x57e   :  { %v1492_v17 = vpack.c.bf16 %v2743_v12, %v1399_v16 }
 0x580   :  { %1526 = vmatmul.mubr.bf16.vlgmr.msra.gmra.mrb[20].mxu0 %v1492_v17  ;;  %1931 = vmatmul.mubr.bf16.vlgmr.msra.gmra.mrb[44].mxu1 %v1492_v17 }
 0x653   :  { %v1527_v61 = vpop.f32.mrb[20].mxu0  ;;  %v1570_v58 = vpop.f32.mrb[44].mxu1 }
 0x654   :  { %v1581_v59 = vadd.f32 %v1527_v61, %v2474_v44  ;;  %v1529_v4 = vpop.f32.mrb[21].mxu0  ;;  %v1932_v0 = vpop.f32.mrb[45].mxu1  ;;  %v1611_v28 = vadd.f32 %v2485_v32, %v1570_v58 }
 0x655   :  { %v1531_v37 = vpop.f32.mrb[22].mxu0  ;;  %v1573_v63 = vpop.f32.mrb[46].mxu1  ;;  %v1582_v23 = vadd.f32 %v1529_v4, %v2476_v46 }
 0x656   :  { %v1708_v54 = vmul.f32 -1.442695, %v1581_v59  ;;  %v1583_v6 = vadd.f32 %v1531_v37, %v2474_v44  ;;  %v1533_v20 = vpop.f32.mrb[23].mxu0  ;;  %v1933_v22 = vpop.f32.mrb[47].mxu1  ;;  %v1612_v43 = vadd.f32 %v2485_v32, %v1573_v63 }
 0x657   :  { %v1584_v24 = vadd.f32 %v1533_v20, %v2476_v46  ;;  %v1709_v29 = vmul.f32 -1.442695, %v1582_v23  ;;  %v1609_v46 = vadd.f32 %v2491_v38, %v1485_v18 }
 0x658   :  { %2105 = vpow2.f32 %v1708_v54  ;;  %v1710_v26 = vmul.f32 -1.442695, %v1583_v6 }
 0x659   :  { %v1711_v33 = vmul.f32 -1.442695, %v1584_v24 }
 0x65a   :  { %2107 = vpow2.f32 %v1710_v26 }
 0x65b   :  { %2109 = vpow2.f32 %v1709_v29 }
 0x65c   :  { %2111 = vpow2.f32 %v1711_v33 }
 0x662   :  { %v2106_v34 = vpop.eup %2105 }
 0x663   :  { %v1597_v25 = vadd.f32 1.0, %v2106_v34 }
 0x664   :  { %v2108_v30 = vpop.eup %2107 }
 0x665   :  { %2113 = vrcp.f32 %v1597_v25  ;;  %v1599_v36 = vadd.f32 1.0, %v2108_v30  ;;  %v2110_v44 = vpop.eup %2109 }
 0x666   :  { %v2112_v27 = vpop.eup %2111  ;;  %v1598_v1 = vadd.f32 1.0, %v2110_v44 }
 0x667   :  { %2115 = vrcp.f32 %v1599_v36  ;;  %v1600_v31 = vadd.f32 1.0, %v2112_v27 }
 0x668   :  { %2117 = vrcp.f32 %v1598_v1 }
 0x669   :  { %2119 = vrcp.f32 %v1600_v31 }
 0x66f   :  { %v2114_v40 = vpop.eup %2113 }
 0x670   :  { %v1613_v42 = vmul.f32 %v2114_v40, %v1611_v28 }
 0x671   :  { %v2116_v7 = vpop.eup %2115 }
 0x672   :  { %v1615_v48 = vadd.f32 %v1613_v42, %v1609_v46  ;;  %v1614_v39 = vmul.f32 %v2116_v7, %v1612_v43  ;;  %v2118_v60 = vpop.eup %2117 }
 0x673   :  { %v2120_v50 = vpop.eup %2119  ;;  %v1619_v51 = vsub.f32 1.0, %v2118_v60  ;;  %v1623_v5 = vmul.f32 %v2118_v60, %v1399_v16 }
 0x674   :  { %2121 = vtanh.f32 %v1615_v48  ;;  %v1616_v49 = vadd.f32 %v1614_v39, %v1610_v47  ;;  %v1620_v52 = vsub.f32 1.0, %v2120_v50  ;;  %v1624_v45 = vmul.f32 %v2120_v50, %v2743_v12 }
 0x676   :  { %2123 = vtanh.f32 %v1616_v49 }
 0x67e   :  { %v2122_v41 = vpop.eup %2121 }
 0x67f   :  { %v1621_v53 = vmul.f32 %v2122_v41, %v1619_v51 }
 0x680   :  { %v2124_v56 = vpop.eup %2123 }
 0x681   :  { %v1622_v32 = vmul.f32 %v2124_v56, %v1620_v52  ;;  %v1625_v38 = vadd.f32 %v1623_v5, %v1621_v53 }
 0x683   :  { %v1626_v55 = vadd.f32 %v1624_v45, %v1622_v32  ;;  %1627 = vst [vmem:[#allocation8] sm:$0xff] %v1625_v38 }
 0x685   :  { %1628 = vst [vmem:[#allocation8 + $0x8] sm:$0xff] %v1626_v55 }
 0x686   :  { %2217 = shalt.err (!%p2214_p0)
}
 0x687   :  { %s2218_s18 = scalar_lea.hbm %s2776_s6, 256 }
 0x688   :  { %p2219_p1 = scmp.ne.s32.totalorder %s2776_s6, %s2218_s18  ;;  %p2222_p2 = scmp.lt.u32.totalorder %s2218_s18, %s2776_s6 }
 0x68a   :  { %p2224_p3 = pnand %p2222_p2, %p2219_p1 }
 0x68c   :  { %2227 = shalt.err (!%p2224_p3)
}
 0x68d   :  { %1640 = dma.vmem_to_hbm [thread:$0]  %s1635_s5, 256, %s2776_s6, [#allocation4], %s2238_s1, %s2238_s1, %s2239_s21  }
 0x68e   :  { %2232 = dma.done.wait [#allocation4], 256  }
 0x68f   :  { %2233 = vsyncadd [#allocation4], 4294967040 }
 0x690   :  { %1644 = vsyncpa [#allocation3], 1 }
 0x691   :  { %1645 = vsyncpa [#allocation6], 1 }
 0x692   :  { %1646 = vsyncpa [#allocation4], 1 }

</bundles_post_ra>
